<compile_context>
chip_gen: v7x
topology: tpu7x:2x2x1
jax: 0.10.0
libtpu: 0.0.40
codegen_flags: <defaults>
</compile_context>

<pallas_src>
import math

import jax
import jax.numpy as jnp
from jax.experimental import pallas as pl
from jax.experimental.pallas import tpu as pltpu

D_MODEL = 8
D_FF = 32
NEG_BIG = -1e30                        # additive mask (matches -inf after softmax)
MASK_FILL = -3.4028234663852886e+38    # torch.finfo(float32).min
EPS = 1e-5
MM_DTYPE = jnp.float32                 # flip to jnp.bfloat16 on v5e (MXU passes /3)

# rows of the per-step fused input blob ([B/TB, R_IN, TB*J*T])
RI_EMB = 0      # 4 rows : embedded-obs features (transposed)
RI_POS = 4      # 8 rows : positional encoding (transposed)
RI_KP = 12      # 1 row  : additive key-padding row (0 / NEG_BIG)
RI_ADD2 = 16    # J rows : enc2 additive mask, laid out [query_job, batch*key_job]


def _rup8(n):
    return ((n + 7) // 8) * 8


def make_layout(J, T, TB):
    """Static group sizes & packed-weight row offsets (shared by packer & kernel)."""
    JT = J * T
    assert JT <= 128, "fused interval attention assumes J*T <= 128"
    G = max(1, 128 // JT)            # batch elems fused per enc1 score matrix
    G_eff = min(G, TB)
    while TB % G_eff:
        G_eff -= 1
    G2 = max(1, 128 // J)            # batch elems fused per enc2 score matrix
    G2_eff = min(G2, TB)
    while TB % G2_eff:
        G2_eff -= 1
    GRP1, GRP2 = G_eff * JT, G2_eff * J
    r_bd1 = 128
    r_bd2 = r_bd1 + _rup8(GRP1)
    r_p1 = r_bd2 + _rup8(GRP2)
    r_pj = r_p1 + _rup8(G_eff * J)
    r_rm2 = r_pj + _rup8(G2_eff)
    r_w = r_rm2 + _rup8(GRP2)
    return dict(G_eff=G_eff, G2_eff=G2_eff, GRP1=GRP1, GRP2=GRP2,
                R_BD1=r_bd1, R_BD2=r_bd2, R_P1=r_p1, R_PJ=r_pj, R_RM2=r_rm2,
                R_W=r_w, R_IN=16 + _rup8(J))


# ----------------------------------------------------------------------------
# Pallas kernel (closure over static J, T, TB, layout).
# ----------------------------------------------------------------------------
def make_actor_kernel(J, T, TB, L, mm_dtype=MM_DTYPE):
    JT = J * T
    NT, NJ = TB * JT, TB * J
    G_eff, G2_eff = L['G_eff'], L['G2_eff']
    GRP1, GRP2 = L['GRP1'], L['GRP2']
    NG1, NG2 = TB // G_eff, TB // G2_eff
    GJ = G_eff * J
    R_BD1, R_BD2 = L['R_BD1'], L['R_BD2']
    R_P1, R_PJ, R_RM2 = L['R_P1'], L['R_PJ'], L['R_RM2']
    scale = 1.0 / math.sqrt(D_MODEL)

    def kernel(inp_ref, w_ref, out_ref, att1_s, xj_s, att2_s, nop_s):
        cast = lambda t: t.astype(mm_dtype)

        def mm(a, b):                                    # [M,K] @ [K,N]
            return jnp.dot(cast(a), cast(b), preferred_element_type=jnp.float32)

        def mm_qk(a, b):                                 # contract D (sublane) axis
            return jnp.einsum('dl,dm->lm', cast(a), cast(b),
                              preferred_element_type=jnp.float32)

        def mm_rt(a, b):                                 # contract the lane axis
            return jnp.einsum('dm,lm->dl', cast(a), cast(b),
                              preferred_element_type=jnp.float32)

        def ln(x, g, b):                                 # LayerNorm over D (sublanes)
            mu = jnp.mean(x, axis=0, keepdims=True)
            var = jnp.mean(jnp.square(x - mu), axis=0, keepdims=True)
            return (x - mu) * jax.lax.rsqrt(var + EPS) * g + b

        def softmax(s):                                  # rows (lane axis) sum to 1
            m = jnp.max(s, axis=-1, keepdims=True)
            e = jnp.exp(s - m)
            return e * pl.reciprocal(jnp.sum(e, axis=-1, keepdims=True), approx=True)

        def encoder(x, base, ng, grp, addm, att_s):
            w_qkv = w_ref[base:base + 24, 0:8]
            b_qkv = w_ref[base:base + 24, 8:9]
            w_out = w_ref[base:base + 8, 16:24]
            b_out = w_ref[base:base + 8, 24:25]
            w_ff1 = w_ref[base:base + 32, 32:40]
            b_ff1 = w_ref[base:base + 32, 40:41]
            w_ff2 = w_ref[base:base + 8, 48:80]
            b_ff2 = w_ref[base:base + 8, 80:81]
            g1 = w_ref[base:base + 8, 88:89]
            b1 = w_ref[base:base + 8, 89:90]
            g2 = w_ref[base:base + 8, 90:91]
            b2 = w_ref[base:base + 8, 91:92]

            h = ln(x, g1, b1)
            qkv = mm(w_qkv, h) + b_qkv                   # [24, N]
            q, k, v = qkv[0:8], qkv[8:16], qkv[16:24]
            for g in range(ng):                          # fused-batch attention groups
                c0 = g * grp
                s = mm_qk(q[:, c0:c0 + grp], k[:, c0:c0 + grp]) * scale + addm(g)
                att_s[:, c0:c0 + grp] = mm_rt(v[:, c0:c0 + grp], softmax(s))
            x = x + mm(w_out, att_s[...]) + b_out
            h2 = ln(x, g2, b2)
            f = jnp.maximum(mm(w_ff1, h2) + b_ff1, 0.0)  # [32, N]
            return x + mm(w_ff2, f) + b_ff2

        # batch-invariant constants (hoisted out of the group loops)
        bd1 = w_ref[R_BD1:R_BD1 + GRP1, 0:GRP1]          # enc1 block-diag additive
        bd2 = w_ref[R_BD2:R_BD2 + GRP2, 0:GRP2]          # enc2 block-diag additive
        rep2 = w_ref[R_RM2:R_RM2 + GRP2, 0:J]            # 0/1 query-row repeat matrix
        pool1 = w_ref[R_P1:R_P1 + GJ, 0:GRP1]            # interval-mean pooling
        poolJ = w_ref[R_PJ:R_PJ + G2_eff, 0:GRP2]        # job-mean pooling

        def addm1(g):                                    # block-diag + key padding
            c0 = g * GRP1
            return bd1 + inp_ref[0, RI_KP:RI_KP + 1, c0:c0 + GRP1]

        def addm2(g):                                    # block-diag + per-batch mask
            c0 = g * GRP2
            return bd2 + mm(rep2, inp_ref[0, RI_ADD2:RI_ADD2 + J, c0:c0 + GRP2])

        # project(embedded_obs) + pos_encoder          x: [D, TB*JT] (transposed)
        x = (mm(w_ref[64:72, 56:60], inp_ref[0, RI_EMB:RI_EMB + 4, :])
             + w_ref[64:72, 60:61] + inp_ref[0, RI_POS:RI_POS + D_MODEL, :])

        # enc1: batch-fused block-diagonal attention over the J*T intervals
        x = encoder(x, 0, NG1, GRP1, addm1, att1_s)

        # mean over the T intervals of every (batch, job): pooling matmul
        for g in range(NG1):
            xj_s[:, g * GJ:(g + 1) * GJ] = jnp.einsum(
                'dm,jm->dj', cast(x[:, g * GRP1:(g + 1) * GRP1]), cast(pool1),
                preferred_element_type=jnp.float32)
        xj = xj_s[...]                                   # [D, TB*J]

        # enc2 over jobs (+ the module's extra residual)
        xa = encoder(xj, 32, NG2, GRP2, addm2, att2_s) + xj

        # fused heads: tanh(xa @ [W1_final | W1_noop] + b1), then 1x32 dots
        h = jnp.tanh(mm(w_ref[64:128, 0:8], xa) + w_ref[64:128, 8:9])   # [64, NJ]
        hf = mm(w_ref[64:65, 16:48], h[0:32, :]) + w_ref[64:65, 48:49]  # [1, NJ]
        hn = mm(w_ref[65:66, 16:48], h[32:64, :]) + w_ref[65:66, 48:49]  # [1, NJ]

        # no_op head: per-batch mean over jobs, replicated back onto job lanes
        for g in range(NG2):
            c0 = g * GRP2
            nb = jnp.einsum('dm,jm->dj', cast(hn[:, c0:c0 + GRP2]), cast(poolJ),
                            preferred_element_type=jnp.float32)          # [1, G2_eff]
            nop_s[:, c0:c0 + GRP2] = mm(nb, poolJ) * float(J)

        out_ref[0, 0:1, :] = hf
        out_ref[0, 1:2, :] = nop_s[...]

    return kernel


# ----------------------------------------------------------------------------
# Host-side packing: weights + batch-invariant constants into one f32 blob.
# ----------------------------------------------------------------------------
def pack_weights(params, J, T, L):
    JT = J * T
    w = jnp.zeros((L['R_W'], 128), jnp.float32)
    for i in range(2):
        b = 32 * i
        qkvT = jnp.concatenate([params['qkv_w'][i, 0].T,
                                params['qkv_w'][i, 1].T,
                                params['qkv_w'][i, 2].T], axis=0)       # [24, 8]
        w = w.at[b:b + 24, 0:8].set(qkvT)
        w = w.at[b:b + 24, 8].set(params['qkv_b'][i].reshape(-1))
        w = w.at[b:b + 8, 16:24].set(params['out_w'][i].T)
        w = w.at[b:b + 8, 24].set(params['out_b'][i])
        w = w.at[b:b + 32, 32:40].set(params['ff1_w'][i].T)
        w = w.at[b:b + 32, 40].set(params['ff1_b'][i])
        w = w.at[b:b + 8, 48:80].set(params['ff2_w'][i].T)
        w = w.at[b:b + 8, 80].set(params['ff2_b'][i])
        w = w.at[b:b + 8, 88].set(params['ln'][i, 0])
        w = w.at[b:b + 8, 89].set(params['ln'][i, 1])
        w = w.at[b:b + 8, 90].set(params['ln'][i, 2])
        w = w.at[b:b + 8, 91].set(params['ln'][i, 3])
    # heads + projection
    w = w.at[64:96, 0:8].set(params['head_w1'][0].T)
    w = w.at[96:128, 0:8].set(params['head_w1'][1].T)
    w = w.at[64:96, 8].set(params['head_b1'][0])
    w = w.at[96:128, 8].set(params['head_b1'][1])
    w = w.at[64, 16:48].set(params['head_w2'][0][:, 0])
    w = w.at[65, 16:48].set(params['head_w2'][1][:, 0])
    w = w.at[64, 48].set(params['head_b2'][0, 0])
    w = w.at[65, 48].set(params['head_b2'][1, 0])
    w = w.at[64:72, 56:60].set(params['proj_w'].T)
    w = w.at[64:72, 60].set(params['proj_b'][0])
    # batch-invariant constants
    G_eff, G2_eff = L['G_eff'], L['G2_eff']
    GRP1, GRP2 = L['GRP1'], L['GRP2']
    t1 = jnp.arange(GRP1)
    bd1 = jnp.where((t1[:, None] // T) == (t1[None, :] // T), 0.0, NEG_BIG)
    w = w.at[L['R_BD1']:L['R_BD1'] + GRP1, 0:GRP1].set(bd1.astype(jnp.float32))
    t2 = jnp.arange(GRP2)
    bd2 = jnp.where((t2[:, None] // J) == (t2[None, :] // J), 0.0, NEG_BIG)
    w = w.at[L['R_BD2']:L['R_BD2'] + GRP2, 0:GRP2].set(bd2.astype(jnp.float32))
    gj = G_eff * J
    pool1 = jnp.where((t1[None, :] // T) == jnp.arange(gj)[:, None], 1.0 / T, 0.0)
    w = w.at[L['R_P1']:L['R_P1'] + gj, 0:GRP1].set(pool1.astype(jnp.float32))
    poolJ = jnp.where((t2[None, :] // J) == jnp.arange(G2_eff)[:, None], 1.0 / J, 0.0)
    w = w.at[L['R_PJ']:L['R_PJ'] + G2_eff, 0:GRP2].set(poolJ.astype(jnp.float32))
    rep2 = jnp.where((t2[:, None] % J) == jnp.arange(J)[None, :], 1.0, 0.0)
    w = w.at[L['R_RM2']:L['R_RM2'] + GRP2, 0:J].set(rep2.astype(jnp.float32))
    return w


# ----------------------------------------------------------------------------
# JAX glue: embedding gathers + fused lane-dense per-step input blob.
# ----------------------------------------------------------------------------
def embed_inputs(params, obs, indexes_inter, tokens_start_end):
    idx_fixed = obs[..., 0].astype(jnp.int32)
    idx_legal = obs[..., 3].astype(jnp.int32)
    emb = jnp.concatenate([params['emb_fixed'][idx_fixed],
                           obs[..., 1:3],
                           params['emb_legal'][idx_legal]], axis=-1)     # [B,J,T,4]
    tok = tokens_start_end.astype(jnp.int32)
    nz = (tok != 0)[..., None]
    emb = jnp.where(nz, params['emb_tokens'][tok], emb)
    pos = params['pe_table'][indexes_inter.astype(jnp.int32)]            # [B,J,T,8]
    pos = jnp.where(nz, 0.0, pos)
    return emb.astype(jnp.float32), pos.astype(jnp.float32)


def pack_inputs(emb, pos, attention_interval_mask, job_resource, TB, L):
    B, J, T, _ = emb.shape
    JT = J * T
    NSTEP, NT, NJ = B // TB, TB * JT, TB * J
    embT = jnp.transpose(emb.reshape(NSTEP, TB, JT, 4),
                         (0, 3, 1, 2)).reshape(NSTEP, 4, NT)
    posT = jnp.transpose(pos.reshape(NSTEP, TB, JT, D_MODEL),
                         (0, 3, 1, 2)).reshape(NSTEP, D_MODEL, NT)
    kp = jnp.where(attention_interval_mask == 1, NEG_BIG, 0.0).astype(jnp.float32)
    kp = kp.reshape(NSTEP, 1, NT)
    a2 = jnp.where(job_resource[:, :-1, :-1] == 0, NEG_BIG, 0.0).astype(jnp.float32)
    a2 = jnp.transpose(a2.reshape(NSTEP, TB, J, J), (0, 2, 1, 3)).reshape(NSTEP, J, NJ)
    blob = jnp.zeros((NSTEP, L['R_IN'], NT), jnp.float32)
    blob = blob.at[:, RI_EMB:RI_EMB + 4, :].set(embT)
    blob = blob.at[:, RI_POS:RI_POS + D_MODEL, :].set(posT)
    blob = blob.at[:, RI_KP:RI_KP + 1, :].set(kp)
    blob = blob.at[:, RI_ADD2:RI_ADD2 + J, 0:NJ].set(a2)
    return blob


# ----------------------------------------------------------------------------
# pallas_call wrapper.
# ----------------------------------------------------------------------------
def _pick_tb(B, J, T, max_tb=128):
    # Largest divisor of B (<= max_tb) whose fused-attention groups tile evenly.
    # A single fat grid step is fine on single-TC v5e/v6e; on v7x megacore an
    # even step count is nice-to-have, but never at the cost of a smaller
    # block (the kernel is DMA/overhead-bound, so bigger TB wins).
    JT = J * T
    G = max(1, 128 // JT)
    G2 = max(1, 128 // J)
    best = 1
    for tb in range(1, min(B, max_tb) + 1):
        if B % tb:
            continue
        if (tb <= G or tb % G == 0) and (tb <= G2 or tb % G2 == 0):
            best = tb
    return best


def actor_pallas(w_blob, inp_blob, L, *, J, T, TB):
    NSTEP, R_IN, NT = inp_blob.shape
    NJ = TB * J
    R_W = w_blob.shape[0]
    # vmem limit sized from the actual (double-buffered) per-step buffers,
    # never below the smallest per-generation scoped default.
    bufs = 2 * (R_IN * NT + R_W * 128 + 2 * NJ) * 4
    scratch = (8 * NT + 2 * 8 * NJ + NJ) * 4
    vmem_limit = int(max(16 << 20, 4 * (bufs + scratch)))

    return pl.pallas_call(
        make_actor_kernel(J, T, TB, L),
        out_shape=jax.ShapeDtypeStruct((NSTEP, 2, NJ), jnp.float32),
        grid=(NSTEP,),
        in_specs=[
            pl.BlockSpec((1, R_IN, NT), lambda i: (i, 0, 0)),   # fused per-step blob
            pl.BlockSpec((R_W, 128), lambda i: (0, 0)),         # weights + constants
        ],
        out_specs=pl.BlockSpec((1, 2, NJ), lambda i: (i, 0, 0)),
        scratch_shapes=[
            pltpu.VMEM((8, NT), jnp.float32),    # enc1 attention output
            pltpu.VMEM((8, NJ), jnp.float32),    # pooled job embeddings
            pltpu.VMEM((8, NJ), jnp.float32),    # enc2 attention output
            pltpu.VMEM((1, NJ), jnp.float32),    # replicated no_op logits
        ],
        compiler_params=pltpu.CompilerParams(
            dimension_semantics=("parallel",),   # megacore split on v7x (no-op on 1 TC)
            vmem_limit_bytes=vmem_limit),
    )(inp_blob, w_blob)


@jax.jit
def actor_forward(params, obs, attention_interval_mask, job_resource, mask,
                  indexes_inter, tokens_start_end):
    B, J, T, _ = obs.shape
    TB = _pick_tb(B, J, T)
    L = make_layout(J, T, TB)
    emb, pos = embed_inputs(params, obs, indexes_inter, tokens_start_end)
    w_blob = pack_weights(params, J, T, L)
    inp_blob = pack_inputs(emb, pos, attention_interval_mask, job_resource, TB, L)
    out = actor_pallas(w_blob, inp_blob, L, J=J, T=T, TB=TB)     # [B/TB, 2, TB*J]
    hf = out[:, 0, :].reshape(B, J)
    no_op = out[:, 1, :].reshape(B, J)[:, 0:1]
    logits = jnp.concatenate([hf, no_op], axis=1)
    # masked_fill(mask == 0, float32.min) on the tiny [B, J+1] result (host side)
    return jnp.where(mask == 0, MASK_FILL, logits)


# ----------------------------------------------------------------------------
# Deterministic parameter init (synthetic; shapes match the nn.Module).
# ----------------------------------------------------------------------------
def init_params(key, max_len=32):
    ks = jax.random.split(key, 16)
    W = lambda k, shape, s=0.3: (s * jax.random.normal(k, shape)).astype(jnp.float32)

    ln_one = jnp.stack([jnp.ones(D_MODEL), jnp.zeros(D_MODEL),
                        jnp.ones(D_MODEL), jnp.zeros(D_MODEL)]).astype(jnp.float32)

    position = jnp.arange(max_len, dtype=jnp.float32)[:, None]
    div = jnp.exp(jnp.arange(0, D_MODEL, 2, dtype=jnp.float32)
                  * (-math.log(10000.0) / D_MODEL))
    pe = jnp.zeros((max_len, D_MODEL), jnp.float32)
    pe = pe.at[:, 0::2].set(jnp.sin(position * div))
    pe = pe.at[:, 1::2].set(jnp.cos(position * div))

    return dict(
        emb_fixed=W(ks[0], (2, 1), 1.0),
        emb_legal=W(ks[1], (2, 1), 1.0),
        emb_tokens=W(ks[2], (3, 4), 1.0),
        pe_table=pe,
        proj_w=W(ks[3], (4, D_MODEL)),
        proj_b=jnp.zeros((1, D_MODEL), jnp.float32),
        ln=jnp.stack([ln_one, ln_one]),                      # [2,4,8]
        qkv_w=W(ks[4], (2, 3, D_MODEL, D_MODEL)),
        qkv_b=W(ks[5], (2, 3, D_MODEL), 0.05),
        out_w=W(ks[6], (2, D_MODEL, D_MODEL)),
        out_b=W(ks[7], (2, D_MODEL), 0.05),
        ff1_w=W(ks[8], (2, D_MODEL, D_FF)),
        ff1_b=W(ks[9], (2, D_FF), 0.05),
        ff2_w=W(ks[10], (2, D_FF, D_MODEL)),
        ff2_b=W(ks[11], (2, D_MODEL), 0.05),
        head_w1=W(ks[12], (2, D_MODEL, D_FF)),
        head_b1=jnp.zeros((2, D_FF), jnp.float32),
        head_w2=W(ks[13], (2, D_FF, 1), 0.01),
        head_b2=jnp.zeros((2, 1), jnp.float32),
    )


# ----------------------------------------------------------------------------
# Pure-JAX reference: per-(batch, job) attention, separate q/k/v weights and
# heads (structurally different from the fused kernel) for validation.
# ----------------------------------------------------------------------------
def _layer_norm(x, g, b):
    mu = jnp.mean(x, axis=-1, keepdims=True)
    var = jnp.mean(jnp.square(x - mu), axis=-1, keepdims=True)
    return (x - mu) * jax.lax.rsqrt(var + EPS) * g + b


def _enc_ref(p, i, x, addm):
    g1, b1, g2, b2 = p['ln'][i]
    h = _layer_norm(x, g1, b1)
    q = h @ p['qkv_w'][i, 0] + p['qkv_b'][i, 0]
    k = h @ p['qkv_w'][i, 1] + p['qkv_b'][i, 1]
    v = h @ p['qkv_w'][i, 2] + p['qkv_b'][i, 2]
    s = jnp.einsum('...ld,...md->...lm', q, k) / math.sqrt(D_MODEL) + addm
    a = jnp.einsum('...lm,...md->...ld', jax.nn.softmax(s, axis=-1), v)
    x = x + (a @ p['out_w'][i] + p['out_b'][i])
    h2 = _layer_norm(x, g2, b2)
    f = jnp.maximum(h2 @ p['ff1_w'][i] + p['ff1_b'][i], 0.0)
    return x + (f @ p['ff2_w'][i] + p['ff2_b'][i])


def reference_forward(p, obs, attention_interval_mask, job_resource, mask,
                      indexes_inter, tokens_start_end):
    emb, pos = embed_inputs(p, obs, indexes_inter, tokens_start_end)
    x = jnp.einsum('bjtf,fd->bjtd', emb, p['proj_w']) + p['proj_b'][0] + pos
    add1 = jnp.where(attention_interval_mask == 1, NEG_BIG, 0.0)[:, :, None, :]
    x = _enc_ref(p, 0, x, add1)
    xj = jnp.mean(x, axis=2)
    add2 = jnp.where(job_resource[:, :-1, :-1] == 0, NEG_BIG, 0.0)
    xa = _enc_ref(p, 1, xj, add2) + xj
    hf = jnp.tanh(xa @ p['head_w1'][0] + p['head_b1'][0]) @ p['head_w2'][0] + p['head_b2'][0]
    hn = jnp.tanh(xa @ p['head_w1'][1] + p['head_b1'][1]) @ p['head_w2'][1] + p['head_b2'][1]
    logits = jnp.concatenate(
        [hf[..., 0], jnp.mean(hn[..., 0], axis=1, keepdims=True)], axis=1)
    return jnp.where(mask == 0, MASK_FILL, logits)


if __name__ == "__main__":
    import numpy as np

    B, J, T = 2, 4, 8
    key = jax.random.PRNGKey(0)
    kp_, k1, k2, k3, k4, k5 = jax.random.split(key, 6)
    params = init_params(kp_)

    obs_fixed = jax.random.bernoulli(k1, 0.5, (B, J, T, 1)).astype(jnp.float32)
    obs_cont = jax.random.normal(k2, (B, J, T, 2), jnp.float32)
    obs_legal = jax.random.bernoulli(k3, 0.5, (B, J, T, 1)).astype(jnp.float32)
    obs = jnp.concatenate([obs_fixed, obs_cont, obs_legal], axis=-1)      # [B,J,T,4]

    attention_interval_mask = jnp.zeros((B, J, T), jnp.float32)
    attention_interval_mask = attention_interval_mask.at[:, :, T - 2:].set(1.0)

    job_resource = jax.random.bernoulli(k4, 0.5, (B, J + 1, J + 1)).astype(jnp.float32)
    diag = jnp.arange(J)
    job_resource = job_resource.at[:, diag, diag].set(1.0)   # avoid fully-masked rows

    mask = jax.random.bernoulli(k5, 0.7, (B, J + 1)).astype(jnp.float32)
    mask = mask.at[:, 0].set(1.0)

    indexes_inter = jnp.broadcast_to(jnp.arange(T, dtype=jnp.int32), (B, J, T))
    tokens_start_end = jnp.zeros((B, J, T), jnp.int32)
    tokens_start_end = tokens_start_end.at[:, :, 0].set(1).at[:, :, T - 1].set(2)

    logits = actor_forward(params, obs, attention_interval_mask, job_resource,
                           mask, indexes_inter, tokens_start_end)
    logits = jax.block_until_ready(logits)

    ref = jax.block_until_ready(reference_forward(
        params, obs, attention_interval_mask, job_resource, mask,
        indexes_inter, tokens_start_end))

    assert logits.shape == (B, J + 1)
    np.testing.assert_allclose(np.asarray(logits), np.asarray(ref),
                               rtol=2e-3, atol=2e-3)
    print("KERNEL_OK")
</pallas_src>

<mosaic_0001>
module attributes {stable_mosaic.version = 11 : i64} {
  func.func @kernel(%arg0: i32, %arg1: memref<1x24x64xf32, #tpu.memory_space<vmem>>, %arg2: memref<224x128xf32, #tpu.memory_space<vmem>>, %arg3: memref<1x2x8xf32, #tpu.memory_space<vmem>>, %arg4: memref<8x64xf32, #tpu.memory_space<vmem>>, %arg5: memref<8x8xf32, #tpu.memory_space<vmem>>, %arg6: memref<8x8xf32, #tpu.memory_space<vmem>>, %arg7: memref<1x8xf32, #tpu.memory_space<vmem>>) attributes {dimension_semantics = [#tpu.dimension_semantics<parallel>], iteration_bounds = array<i64: 1>, scalar_prefetch = 0 : i64, scratch_operands = 4 : i64, tpu.core_type = #tpu.core_type<tc>, window_params = [{transform_indices = @transform_0, window_bounds = array<i64: 1, 24, 64>}, {pipeline_mode = #tpu.pipeline_mode<synchronous>, transform_indices = @transform_1, window_bounds = array<i64: 224, 128>}, {transform_indices = @transform_2, window_bounds = array<i64: 1, 2, 8>}]} {
    %c128 = arith.constant 128 : index
    %c0 = arith.constant 0 : index
    %0 = vector.load %arg2[%c128, %c0] : memref<224x128xf32, #tpu.memory_space<vmem>>, vector<64x64xf32>
    %c192 = arith.constant 192 : index
    %c0_0 = arith.constant 0 : index
    %1 = vector.load %arg2[%c192, %c0_0] : memref<224x128xf32, #tpu.memory_space<vmem>>, vector<8x8xf32>
    %c216 = arith.constant 216 : index
    %c0_1 = arith.constant 0 : index
    %2 = vector.load %arg2[%c216, %c0_1] : memref<224x128xf32, #tpu.memory_space<vmem>>, vector<8x4xf32>
    %c200 = arith.constant 200 : index
    %c0_2 = arith.constant 0 : index
    %3 = vector.load %arg2[%c200, %c0_2] : memref<224x128xf32, #tpu.memory_space<vmem>>, vector<8x64xf32>
    %c208 = arith.constant 208 : index
    %c0_3 = arith.constant 0 : index
    %4 = vector.load %arg2[%c208, %c0_3] : memref<224x128xf32, #tpu.memory_space<vmem>>, vector<2x8xf32>
    %c64 = arith.constant 64 : index
    %c56 = arith.constant 56 : index
    %5 = vector.load %arg2[%c64, %c56] : memref<224x128xf32, #tpu.memory_space<vmem>>, vector<8x4xf32>
    %c0_4 = arith.constant 0 : index
    %c0_5 = arith.constant 0 : index
    %c0_6 = arith.constant 0 : index
    %6 = vector.load %arg1[%c0_4, %c0_5, %c0_6] : memref<1x24x64xf32, #tpu.memory_space<vmem>>, vector<1x4x64xf32>
    %7 = vector.shape_cast %6 : vector<1x4x64xf32> to vector<4x64xf32>
    %cst = arith.constant dense<0.000000e+00> : vector<8x64xf32>
    %8 = tpu.matmul %5, %7, %cst {dimension_numbers = #tpu.dot_dimension_numbers<[1], [0], [0], [1], [0, 0, 1, 1], [], []>} : vector<8x4xf32>, vector<4x64xf32>, vector<8x64xf32> -> vector<8x64xf32>
    %c64_7 = arith.constant 64 : index
    %c60 = arith.constant 60 : index
    %9 = vector.load %arg2[%c64_7, %c60] : memref<224x128xf32, #tpu.memory_space<vmem>>, vector<8x1xf32>
    %10 = vector.broadcast %9 : vector<8x1xf32> to vector<8x64xf32>
    %11 = arith.addf %8, %10 : vector<8x64xf32>
    %c0_8 = arith.constant 0 : index
    %c4 = arith.constant 4 : index
    %c0_9 = arith.constant 0 : index
    %12 = vector.load %arg1[%c0_8, %c4, %c0_9] : memref<1x24x64xf32, #tpu.memory_space<vmem>>, vector<1x8x64xf32>
    %13 = vector.shape_cast %12 : vector<1x8x64xf32> to vector<8x64xf32>
    %14 = arith.addf %11, %13 : vector<8x64xf32>
    %c0_10 = arith.constant 0 : index
    %c0_11 = arith.constant 0 : index
    %15 = vector.load %arg2[%c0_10, %c0_11] : memref<224x128xf32, #tpu.memory_space<vmem>>, vector<24x8xf32>
    %c0_12 = arith.constant 0 : index
    %c8 = arith.constant 8 : index
    %16 = vector.load %arg2[%c0_12, %c8] : memref<224x128xf32, #tpu.memory_space<vmem>>, vector<24x1xf32>
    %c0_13 = arith.constant 0 : index
    %c16 = arith.constant 16 : index
    %17 = vector.load %arg2[%c0_13, %c16] : memref<224x128xf32, #tpu.memory_space<vmem>>, vector<8x8xf32>
    %c0_14 = arith.constant 0 : index
    %c24 = arith.constant 24 : index
    %18 = vector.load %arg2[%c0_14, %c24] : memref<224x128xf32, #tpu.memory_space<vmem>>, vector<8x1xf32>
    %c0_15 = arith.constant 0 : index
    %c32 = arith.constant 32 : index
    %19 = vector.load %arg2[%c0_15, %c32] : memref<224x128xf32, #tpu.memory_space<vmem>>, vector<32x8xf32>
    %c0_16 = arith.constant 0 : index
    %c40 = arith.constant 40 : index
    %20 = vector.load %arg2[%c0_16, %c40] : memref<224x128xf32, #tpu.memory_space<vmem>>, vector<32x1xf32>
    %c0_17 = arith.constant 0 : index
    %c48 = arith.constant 48 : index
    %21 = vector.load %arg2[%c0_17, %c48] : memref<224x128xf32, #tpu.memory_space<vmem>>, vector<8x32xf32>
    %c0_18 = arith.constant 0 : index
    %c80 = arith.constant 80 : index
    %22 = vector.load %arg2[%c0_18, %c80] : memref<224x128xf32, #tpu.memory_space<vmem>>, vector<8x1xf32>
    %c0_19 = arith.constant 0 : index
    %c88 = arith.constant 88 : index
    %23 = vector.load %arg2[%c0_19, %c88] : memref<224x128xf32, #tpu.memory_space<vmem>>, vector<8x1xf32>
    %c0_20 = arith.constant 0 : index
    %c89 = arith.constant 89 : index
    %24 = vector.load %arg2[%c0_20, %c89] : memref<224x128xf32, #tpu.memory_space<vmem>>, vector<8x1xf32>
    %c0_21 = arith.constant 0 : index
    %c90 = arith.constant 90 : index
    %25 = vector.load %arg2[%c0_21, %c90] : memref<224x128xf32, #tpu.memory_space<vmem>>, vector<8x1xf32>
    %c0_22 = arith.constant 0 : index
    %c91 = arith.constant 91 : index
    %26 = vector.load %arg2[%c0_22, %c91] : memref<224x128xf32, #tpu.memory_space<vmem>>, vector<8x1xf32>
    %cst_23 = arith.constant dense<0.000000e+00> : vector<64xf32>
    %27 = vector.multi_reduction <add>, %14, %cst_23 [0] : vector<8x64xf32> to vector<64xf32>
    %28 = vector.shape_cast %27 : vector<64xf32> to vector<1x64xf32>
    %cst_24 = arith.constant 8.000000e+00 : f32
    %29 = vector.broadcast %cst_24 : f32 to vector<1x64xf32>
    %30 = arith.divf %28, %29 : vector<1x64xf32>
    %31 = vector.broadcast %30 : vector<1x64xf32> to vector<8x64xf32>
    %32 = arith.subf %14, %31 : vector<8x64xf32>
    %33 = arith.mulf %32, %32 : vector<8x64xf32>
    %cst_25 = arith.constant dense<0.000000e+00> : vector<64xf32>
    %34 = vector.multi_reduction <add>, %33, %cst_25 [0] : vector<8x64xf32> to vector<64xf32>
    %35 = vector.shape_cast %34 : vector<64xf32> to vector<1x64xf32>
    %cst_26 = arith.constant 8.000000e+00 : f32
    %36 = vector.broadcast %cst_26 : f32 to vector<1x64xf32>
    %37 = arith.divf %35, %36 : vector<1x64xf32>
    %38 = vector.broadcast %30 : vector<1x64xf32> to vector<8x64xf32>
    %39 = arith.subf %14, %38 : vector<8x64xf32>
    %cst_27 = arith.constant 9.99999974E-6 : f32
    %40 = vector.broadcast %cst_27 : f32 to vector<1x64xf32>
    %41 = arith.addf %37, %40 : vector<1x64xf32>
    %42 = math.rsqrt %41 : vector<1x64xf32>
    %43 = vector.broadcast %42 : vector<1x64xf32> to vector<8x64xf32>
    %44 = arith.mulf %39, %43 : vector<8x64xf32>
    %45 = vector.broadcast %23 : vector<8x1xf32> to vector<8x64xf32>
    %46 = arith.mulf %44, %45 : vector<8x64xf32>
    %47 = vector.broadcast %24 : vector<8x1xf32> to vector<8x64xf32>
    %48 = arith.addf %46, %47 : vector<8x64xf32>
    %cst_28 = arith.constant dense<0.000000e+00> : vector<24x64xf32>
    %49 = tpu.matmul %15, %48, %cst_28 {dimension_numbers = #tpu.dot_dimension_numbers<[1], [0], [0], [1], [0, 0, 1, 1], [], []>} : vector<24x8xf32>, vector<8x64xf32>, vector<24x64xf32> -> vector<24x64xf32>
    %50 = vector.broadcast %16 : vector<24x1xf32> to vector<24x64xf32>
    %51 = arith.addf %49, %50 : vector<24x64xf32>
    %52 = vector.extract_strided_slice %51 {offsets = [0, 0], sizes = [8, 64], strides = [1, 1]} : vector<24x64xf32> to vector<8x64xf32>
    %53 = vector.extract_strided_slice %51 {offsets = [8, 0], sizes = [8, 64], strides = [1, 1]} : vector<24x64xf32> to vector<8x64xf32>
    %54 = vector.extract_strided_slice %51 {offsets = [16, 0], sizes = [8, 64], strides = [1, 1]} : vector<24x64xf32> to vector<8x64xf32>
    "tpu.trace_start"() <{level = 10 : i32, message = "dl,dm->lm"}> : () -> ()
    %cst_29 = arith.constant dense<0.000000e+00> : vector<64x64xf32>
    %55 = tpu.matmul %52, %53, %cst_29 {dimension_numbers = #tpu.dot_dimension_numbers<[0], [0], [1], [1], [0, 1, 1, 1], [], []>} : vector<8x64xf32>, vector<8x64xf32>, vector<64x64xf32> -> vector<64x64xf32>
    "tpu.trace_stop"() : () -> ()
    %cst_30 = arith.constant 0.353553385 : f32
    %56 = vector.broadcast %cst_30 : f32 to vector<64x64xf32>
    %57 = arith.mulf %55, %56 : vector<64x64xf32>
    %c0_31 = arith.constant 0 : index
    %c12 = arith.constant 12 : index
    %c0_32 = arith.constant 0 : index
    %58 = vector.load %arg1[%c0_31, %c12, %c0_32] : memref<1x24x64xf32, #tpu.memory_space<vmem>>, vector<1x1x64xf32>
    %59 = vector.shape_cast %58 : vector<1x1x64xf32> to vector<1x64xf32>
    %60 = vector.broadcast %59 : vector<1x64xf32> to vector<64x64xf32>
    %61 = arith.addf %0, %60 : vector<64x64xf32>
    %62 = arith.addf %57, %61 : vector<64x64xf32>
    %cst_33 = arith.constant dense<0xFF800000> : vector<64xf32>
    %63 = vector.multi_reduction <maximumf>, %62, %cst_33 [1] : vector<64x64xf32> to vector<64xf32>
    %64 = vector.shape_cast %63 : vector<64xf32> to vector<64x1xf32>
    %65 = vector.broadcast %64 : vector<64x1xf32> to vector<64x64xf32>
    %66 = arith.subf %62, %65 : vector<64x64xf32>
    %67 = math.exp %66 : vector<64x64xf32>
    %cst_34 = arith.constant dense<0.000000e+00> : vector<64xf32>
    %68 = vector.multi_reduction <add>, %67, %cst_34 [1] : vector<64x64xf32> to vector<64xf32>
    %69 = vector.shape_cast %68 : vector<64xf32> to vector<64x1xf32>
    %70 = tpu.reciprocal %69 {approx = true} : vector<64x1xf32> -> vector<64x1xf32>
    %71 = vector.broadcast %70 : vector<64x1xf32> to vector<64x64xf32>
    %72 = arith.mulf %67, %71 : vector<64x64xf32>
    "tpu.trace_start"() <{level = 10 : i32, message = "dm,lm->dl"}> : () -> ()
    %cst_35 = arith.constant dense<0.000000e+00> : vector<8x64xf32>
    %73 = tpu.matmul %54, %72, %cst_35 {dimension_numbers = #tpu.dot_dimension_numbers<[1], [1], [0], [0], [0, 0, 1, 0], [], []>} : vector<8x64xf32>, vector<64x64xf32>, vector<8x64xf32> -> vector<8x64xf32>
    "tpu.trace_stop"() : () -> ()
    %c0_36 = arith.constant 0 : index
    %c0_37 = arith.constant 0 : index
    %74 = vector.load %arg4[%c0_36, %c0_37] : memref<8x64xf32, #tpu.memory_space<vmem>>, vector<8x64xf32>
    tpu.vector_store %arg4[%c0_36, %c0_37], %73 {strides = array<i32>} : memref<8x64xf32, #tpu.memory_space<vmem>>, vector<8x64xf32>,
    %c0_38 = arith.constant 0 : index
    %c0_39 = arith.constant 0 : index
    %75 = vector.load %arg4[%c0_38, %c0_39] : memref<8x64xf32, #tpu.memory_space<vmem>>, vector<8x64xf32>
    %cst_40 = arith.constant dense<0.000000e+00> : vector<8x64xf32>
    %76 = tpu.matmul %17, %75, %cst_40 {dimension_numbers = #tpu.dot_dimension_numbers<[1], [0], [0], [1], [0, 0, 1, 1], [], []>} : vector<8x8xf32>, vector<8x64xf32>, vector<8x64xf32> -> vector<8x64xf32>
    %77 = arith.addf %14, %76 : vector<8x64xf32>
    %78 = vector.broadcast %18 : vector<8x1xf32> to vector<8x64xf32>
    %79 = arith.addf %77, %78 : vector<8x64xf32>
    %cst_41 = arith.constant dense<0.000000e+00> : vector<64xf32>
    %80 = vector.multi_reduction <add>, %79, %cst_41 [0] : vector<8x64xf32> to vector<64xf32>
    %81 = vector.shape_cast %80 : vector<64xf32> to vector<1x64xf32>
    %cst_42 = arith.constant 8.000000e+00 : f32
    %82 = vector.broadcast %cst_42 : f32 to vector<1x64xf32>
    %83 = arith.divf %81, %82 : vector<1x64xf32>
    %84 = vector.broadcast %83 : vector<1x64xf32> to vector<8x64xf32>
    %85 = arith.subf %79, %84 : vector<8x64xf32>
    %86 = arith.mulf %85, %85 : vector<8x64xf32>
    %cst_43 = arith.constant dense<0.000000e+00> : vector<64xf32>
    %87 = vector.multi_reduction <add>, %86, %cst_43 [0] : vector<8x64xf32> to vector<64xf32>
    %88 = vector.shape_cast %87 : vector<64xf32> to vector<1x64xf32>
    %cst_44 = arith.constant 8.000000e+00 : f32
    %89 = vector.broadcast %cst_44 : f32 to vector<1x64xf32>
    %90 = arith.divf %88, %89 : vector<1x64xf32>
    %91 = vector.broadcast %83 : vector<1x64xf32> to vector<8x64xf32>
    %92 = arith.subf %79, %91 : vector<8x64xf32>
    %cst_45 = arith.constant 9.99999974E-6 : f32
    %93 = vector.broadcast %cst_45 : f32 to vector<1x64xf32>
    %94 = arith.addf %90, %93 : vector<1x64xf32>
    %95 = math.rsqrt %94 : vector<1x64xf32>
    %96 = vector.broadcast %95 : vector<1x64xf32> to vector<8x64xf32>
    %97 = arith.mulf %92, %96 : vector<8x64xf32>
    %98 = vector.broadcast %25 : vector<8x1xf32> to vector<8x64xf32>
    %99 = arith.mulf %97, %98 : vector<8x64xf32>
    %100 = vector.broadcast %26 : vector<8x1xf32> to vector<8x64xf32>
    %101 = arith.addf %99, %100 : vector<8x64xf32>
    %cst_46 = arith.constant dense<0.000000e+00> : vector<32x64xf32>
    %102 = tpu.matmul %19, %101, %cst_46 {dimension_numbers = #tpu.dot_dimension_numbers<[1], [0], [0], [1], [0, 0, 1, 1], [], []>} : vector<32x8xf32>, vector<8x64xf32>, vector<32x64xf32> -> vector<32x64xf32>
    %103 = vector.broadcast %20 : vector<32x1xf32> to vector<32x64xf32>
    %104 = arith.addf %102, %103 : vector<32x64xf32>
    %cst_47 = arith.constant 0.000000e+00 : f32
    %105 = vector.broadcast %cst_47 : f32 to vector<32x64xf32>
    %106 = arith.maximumf %104, %105 : vector<32x64xf32>
    %cst_48 = arith.constant dense<0.000000e+00> : vector<8x64xf32>
    %107 = tpu.matmul %21, %106, %cst_48 {dimension_numbers = #tpu.dot_dimension_numbers<[1], [0], [0], [1], [0, 0, 1, 1], [], []>} : vector<8x32xf32>, vector<32x64xf32>, vector<8x64xf32> -> vector<8x64xf32>
    %108 = arith.addf %79, %107 : vector<8x64xf32>
    %109 = vector.broadcast %22 : vector<8x1xf32> to vector<8x64xf32>
    %110 = arith.addf %108, %109 : vector<8x64xf32>
    "tpu.trace_start"() <{level = 10 : i32, message = "dm,jm->dj"}> : () -> ()
    %cst_49 = arith.constant dense<0.000000e+00> : vector<8x8xf32>
    %111 = tpu.matmul %110, %3, %cst_49 {dimension_numbers = #tpu.dot_dimension_numbers<[1], [1], [0], [0], [0, 0, 1, 0], [], []>} : vector<8x64xf32>, vector<8x64xf32>, vector<8x8xf32> -> vector<8x8xf32>
    "tpu.trace_stop"() : () -> ()
    %c0_50 = arith.constant 0 : index
    %c0_51 = arith.constant 0 : index
    %112 = vector.load %arg5[%c0_50, %c0_51] : memref<8x8xf32, #tpu.memory_space<vmem>>, vector<8x8xf32>
    tpu.vector_store %arg5[%c0_50, %c0_51], %111 {strides = array<i32>} : memref<8x8xf32, #tpu.memory_space<vmem>>, vector<8x8xf32>,
    %c0_52 = arith.constant 0 : index
    %c0_53 = arith.constant 0 : index
    %113 = vector.load %arg5[%c0_52, %c0_53] : memref<8x8xf32, #tpu.memory_space<vmem>>, vector<8x8xf32>
    %c32_54 = arith.constant 32 : index
    %c0_55 = arith.constant 0 : index
    %114 = vector.load %arg2[%c32_54, %c0_55] : memref<224x128xf32, #tpu.memory_space<vmem>>, vector<24x8xf32>
    %c32_56 = arith.constant 32 : index
    %c8_57 = arith.constant 8 : index
    %115 = vector.load %arg2[%c32_56, %c8_57] : memref<224x128xf32, #tpu.memory_space<vmem>>, vector<24x1xf32>
    %c32_58 = arith.constant 32 : index
    %c16_59 = arith.constant 16 : index
    %116 = vector.load %arg2[%c32_58, %c16_59] : memref<224x128xf32, #tpu.memory_space<vmem>>, vector<8x8xf32>
    %c32_60 = arith.constant 32 : index
    %c24_61 = arith.constant 24 : index
    %117 = vector.load %arg2[%c32_60, %c24_61] : memref<224x128xf32, #tpu.memory_space<vmem>>, vector<8x1xf32>
    %c32_62 = arith.constant 32 : index
    %c32_63 = arith.constant 32 : index
    %118 = vector.load %arg2[%c32_62, %c32_63] : memref<224x128xf32, #tpu.memory_space<vmem>>, vector<32x8xf32>
    %c32_64 = arith.constant 32 : index
    %c40_65 = arith.constant 40 : index
    %119 = vector.load %arg2[%c32_64, %c40_65] : memref<224x128xf32, #tpu.memory_space<vmem>>, vector<32x1xf32>
    %c32_66 = arith.constant 32 : index
    %c48_67 = arith.constant 48 : index
    %120 = vector.load %arg2[%c32_66, %c48_67] : memref<224x128xf32, #tpu.memory_space<vmem>>, vector<8x32xf32>
    %c32_68 = arith.constant 32 : index
    %c80_69 = arith.constant 80 : index
    %121 = vector.load %arg2[%c32_68, %c80_69] : memref<224x128xf32, #tpu.memory_space<vmem>>, vector<8x1xf32>
    %c32_70 = arith.constant 32 : index
    %c88_71 = arith.constant 88 : index
    %122 = vector.load %arg2[%c32_70, %c88_71] : memref<224x128xf32, #tpu.memory_space<vmem>>, vector<8x1xf32>
    %c32_72 = arith.constant 32 : index
    %c89_73 = arith.constant 89 : index
    %123 = vector.load %arg2[%c32_72, %c89_73] : memref<224x128xf32, #tpu.memory_space<vmem>>, vector<8x1xf32>
    %c32_74 = arith.constant 32 : index
    %c90_75 = arith.constant 90 : index
    %124 = vector.load %arg2[%c32_74, %c90_75] : memref<224x128xf32, #tpu.memory_space<vmem>>, vector<8x1xf32>
    %c32_76 = arith.constant 32 : index
    %c91_77 = arith.constant 91 : index
    %125 = vector.load %arg2[%c32_76, %c91_77] : memref<224x128xf32, #tpu.memory_space<vmem>>, vector<8x1xf32>
    %cst_78 = arith.constant dense<0.000000e+00> : vector<8xf32>
    %126 = vector.multi_reduction <add>, %113, %cst_78 [0] : vector<8x8xf32> to vector<8xf32>
    %127 = vector.shape_cast %126 : vector<8xf32> to vector<1x8xf32>
    %cst_79 = arith.constant 8.000000e+00 : f32
    %128 = vector.broadcast %cst_79 : f32 to vector<1x8xf32>
    %129 = arith.divf %127, %128 : vector<1x8xf32>
    %130 = vector.broadcast %129 : vector<1x8xf32> to vector<8x8xf32>
    %131 = arith.subf %113, %130 : vector<8x8xf32>
    %132 = arith.mulf %131, %131 : vector<8x8xf32>
    %cst_80 = arith.constant dense<0.000000e+00> : vector<8xf32>
    %133 = vector.multi_reduction <add>, %132, %cst_80 [0] : vector<8x8xf32> to vector<8xf32>
    %134 = vector.shape_cast %133 : vector<8xf32> to vector<1x8xf32>
    %cst_81 = arith.constant 8.000000e+00 : f32
    %135 = vector.broadcast %cst_81 : f32 to vector<1x8xf32>
    %136 = arith.divf %134, %135 : vector<1x8xf32>
    %137 = vector.broadcast %129 : vector<1x8xf32> to vector<8x8xf32>
    %138 = arith.subf %113, %137 : vector<8x8xf32>
    %cst_82 = arith.constant 9.99999974E-6 : f32
    %139 = vector.broadcast %cst_82 : f32 to vector<1x8xf32>
    %140 = arith.addf %136, %139 : vector<1x8xf32>
    %141 = math.rsqrt %140 : vector<1x8xf32>
    %142 = vector.broadcast %141 : vector<1x8xf32> to vector<8x8xf32>
    %143 = arith.mulf %138, %142 : vector<8x8xf32>
    %144 = vector.broadcast %122 : vector<8x1xf32> to vector<8x8xf32>
    %145 = arith.mulf %143, %144 : vector<8x8xf32>
    %146 = vector.broadcast %123 : vector<8x1xf32> to vector<8x8xf32>
    %147 = arith.addf %145, %146 : vector<8x8xf32>
    %cst_83 = arith.constant dense<0.000000e+00> : vector<24x8xf32>
    %148 = tpu.matmul %114, %147, %cst_83 {dimension_numbers = #tpu.dot_dimension_numbers<[1], [0], [0], [1], [0, 0, 1, 1], [], []>} : vector<24x8xf32>, vector<8x8xf32>, vector<24x8xf32> -> vector<24x8xf32>
    %149 = vector.broadcast %115 : vector<24x1xf32> to vector<24x8xf32>
    %150 = arith.addf %148, %149 : vector<24x8xf32>
    %151 = vector.extract_strided_slice %150 {offsets = [0, 0], sizes = [8, 8], strides = [1, 1]} : vector<24x8xf32> to vector<8x8xf32>
    %152 = vector.extract_strided_slice %150 {offsets = [8, 0], sizes = [8, 8], strides = [1, 1]} : vector<24x8xf32> to vector<8x8xf32>
    %153 = vector.extract_strided_slice %150 {offsets = [16, 0], sizes = [8, 8], strides = [1, 1]} : vector<24x8xf32> to vector<8x8xf32>
    "tpu.trace_start"() <{level = 10 : i32, message = "dl,dm->lm"}> : () -> ()
    %cst_84 = arith.constant dense<0.000000e+00> : vector<8x8xf32>
    %154 = tpu.matmul %151, %152, %cst_84 {dimension_numbers = #tpu.dot_dimension_numbers<[0], [0], [1], [1], [0, 1, 1, 1], [], []>} : vector<8x8xf32>, vector<8x8xf32>, vector<8x8xf32> -> vector<8x8xf32>
    "tpu.trace_stop"() : () -> ()
    %cst_85 = arith.constant 0.353553385 : f32
    %155 = vector.broadcast %cst_85 : f32 to vector<8x8xf32>
    %156 = arith.mulf %154, %155 : vector<8x8xf32>
    %c0_86 = arith.constant 0 : index
    %c16_87 = arith.constant 16 : index
    %c0_88 = arith.constant 0 : index
    %157 = vector.load %arg1[%c0_86, %c16_87, %c0_88] : memref<1x24x64xf32, #tpu.memory_space<vmem>>, vector<1x4x8xf32>
    %158 = vector.shape_cast %157 : vector<1x4x8xf32> to vector<4x8xf32>
    %cst_89 = arith.constant dense<0.000000e+00> : vector<8x8xf32>
    %159 = tpu.matmul %2, %158, %cst_89 {dimension_numbers = #tpu.dot_dimension_numbers<[1], [0], [0], [1], [0, 0, 1, 1], [], []>} : vector<8x4xf32>, vector<4x8xf32>, vector<8x8xf32> -> vector<8x8xf32>
    %160 = arith.addf %1, %159 : vector<8x8xf32>
    %161 = arith.addf %156, %160 : vector<8x8xf32>
    %cst_90 = arith.constant dense<0xFF800000> : vector<8xf32>
    %162 = vector.multi_reduction <maximumf>, %161, %cst_90 [1] : vector<8x8xf32> to vector<8xf32>
    %163 = vector.shape_cast %162 : vector<8xf32> to vector<8x1xf32>
    %164 = vector.broadcast %163 : vector<8x1xf32> to vector<8x8xf32>
    %165 = arith.subf %161, %164 : vector<8x8xf32>
    %166 = math.exp %165 : vector<8x8xf32>
    %cst_91 = arith.constant dense<0.000000e+00> : vector<8xf32>
    %167 = vector.multi_reduction <add>, %166, %cst_91 [1] : vector<8x8xf32> to vector<8xf32>
    %168 = vector.shape_cast %167 : vector<8xf32> to vector<8x1xf32>
    %169 = tpu.reciprocal %168 {approx = true} : vector<8x1xf32> -> vector<8x1xf32>
    %170 = vector.broadcast %169 : vector<8x1xf32> to vector<8x8xf32>
    %171 = arith.mulf %166, %170 : vector<8x8xf32>
    "tpu.trace_start"() <{level = 10 : i32, message = "dm,lm->dl"}> : () -> ()
    %cst_92 = arith.constant dense<0.000000e+00> : vector<8x8xf32>
    %172 = tpu.matmul %153, %171, %cst_92 {dimension_numbers = #tpu.dot_dimension_numbers<[1], [1], [0], [0], [0, 0, 1, 0], [], []>} : vector<8x8xf32>, vector<8x8xf32>, vector<8x8xf32> -> vector<8x8xf32>
    "tpu.trace_stop"() : () -> ()
    %c0_93 = arith.constant 0 : index
    %c0_94 = arith.constant 0 : index
    %173 = vector.load %arg6[%c0_93, %c0_94] : memref<8x8xf32, #tpu.memory_space<vmem>>, vector<8x8xf32>
    tpu.vector_store %arg6[%c0_93, %c0_94], %172 {strides = array<i32>} : memref<8x8xf32, #tpu.memory_space<vmem>>, vector<8x8xf32>,
    %c0_95 = arith.constant 0 : index
    %c0_96 = arith.constant 0 : index
    %174 = vector.load %arg6[%c0_95, %c0_96] : memref<8x8xf32, #tpu.memory_space<vmem>>, vector<8x8xf32>
    %cst_97 = arith.constant dense<0.000000e+00> : vector<8x8xf32>
    %175 = tpu.matmul %116, %174, %cst_97 {dimension_numbers = #tpu.dot_dimension_numbers<[1], [0], [0], [1], [0, 0, 1, 1], [], []>} : vector<8x8xf32>, vector<8x8xf32>, vector<8x8xf32> -> vector<8x8xf32>
    %176 = arith.addf %113, %175 : vector<8x8xf32>
    %177 = vector.broadcast %117 : vector<8x1xf32> to vector<8x8xf32>
    %178 = arith.addf %176, %177 : vector<8x8xf32>
    %cst_98 = arith.constant dense<0.000000e+00> : vector<8xf32>
    %179 = vector.multi_reduction <add>, %178, %cst_98 [0] : vector<8x8xf32> to vector<8xf32>
    %180 = vector.shape_cast %179 : vector<8xf32> to vector<1x8xf32>
    %cst_99 = arith.constant 8.000000e+00 : f32
    %181 = vector.broadcast %cst_99 : f32 to vector<1x8xf32>
    %182 = arith.divf %180, %181 : vector<1x8xf32>
    %183 = vector.broadcast %182 : vector<1x8xf32> to vector<8x8xf32>
    %184 = arith.subf %178, %183 : vector<8x8xf32>
    %185 = arith.mulf %184, %184 : vector<8x8xf32>
    %cst_100 = arith.constant dense<0.000000e+00> : vector<8xf32>
    %186 = vector.multi_reduction <add>, %185, %cst_100 [0] : vector<8x8xf32> to vector<8xf32>
    %187 = vector.shape_cast %186 : vector<8xf32> to vector<1x8xf32>
    %cst_101 = arith.constant 8.000000e+00 : f32
    %188 = vector.broadcast %cst_101 : f32 to vector<1x8xf32>
    %189 = arith.divf %187, %188 : vector<1x8xf32>
    %190 = vector.broadcast %182 : vector<1x8xf32> to vector<8x8xf32>
    %191 = arith.subf %178, %190 : vector<8x8xf32>
    %cst_102 = arith.constant 9.99999974E-6 : f32
    %192 = vector.broadcast %cst_102 : f32 to vector<1x8xf32>
    %193 = arith.addf %189, %192 : vector<1x8xf32>
    %194 = math.rsqrt %193 : vector<1x8xf32>
    %195 = vector.broadcast %194 : vector<1x8xf32> to vector<8x8xf32>
    %196 = arith.mulf %191, %195 : vector<8x8xf32>
    %197 = vector.broadcast %124 : vector<8x1xf32> to vector<8x8xf32>
    %198 = arith.mulf %196, %197 : vector<8x8xf32>
    %199 = vector.broadcast %125 : vector<8x1xf32> to vector<8x8xf32>
    %200 = arith.addf %198, %199 : vector<8x8xf32>
    %cst_103 = arith.constant dense<0.000000e+00> : vector<32x8xf32>
    %201 = tpu.matmul %118, %200, %cst_103 {dimension_numbers = #tpu.dot_dimension_numbers<[1], [0], [0], [1], [0, 0, 1, 1], [], []>} : vector<32x8xf32>, vector<8x8xf32>, vector<32x8xf32> -> vector<32x8xf32>
    %202 = vector.broadcast %119 : vector<32x1xf32> to vector<32x8xf32>
    %203 = arith.addf %201, %202 : vector<32x8xf32>
    %cst_104 = arith.constant 0.000000e+00 : f32
    %204 = vector.broadcast %cst_104 : f32 to vector<32x8xf32>
    %205 = arith.maximumf %203, %204 : vector<32x8xf32>
    %cst_105 = arith.constant dense<0.000000e+00> : vector<8x8xf32>
    %206 = tpu.matmul %120, %205, %cst_105 {dimension_numbers = #tpu.dot_dimension_numbers<[1], [0], [0], [1], [0, 0, 1, 1], [], []>} : vector<8x32xf32>, vector<32x8xf32>, vector<8x8xf32> -> vector<8x8xf32>
    %207 = arith.addf %178, %206 : vector<8x8xf32>
    %208 = vector.broadcast %121 : vector<8x1xf32> to vector<8x8xf32>
    %209 = arith.addf %207, %208 : vector<8x8xf32>
    %210 = arith.addf %209, %113 : vector<8x8xf32>
    %c64_106 = arith.constant 64 : index
    %c0_107 = arith.constant 0 : index
    %211 = vector.load %arg2[%c64_106, %c0_107] : memref<224x128xf32, #tpu.memory_space<vmem>>, vector<64x8xf32>
    %cst_108 = arith.constant dense<0.000000e+00> : vector<64x8xf32>
    %212 = tpu.matmul %211, %210, %cst_108 {dimension_numbers = #tpu.dot_dimension_numbers<[1], [0], [0], [1], [0, 0, 1, 1], [], []>} : vector<64x8xf32>, vector<8x8xf32>, vector<64x8xf32> -> vector<64x8xf32>
    %c64_109 = arith.constant 64 : index
    %c8_110 = arith.constant 8 : index
    %213 = vector.load %arg2[%c64_109, %c8_110] : memref<224x128xf32, #tpu.memory_space<vmem>>, vector<64x1xf32>
    %214 = vector.broadcast %213 : vector<64x1xf32> to vector<64x8xf32>
    %215 = arith.addf %212, %214 : vector<64x8xf32>
    %216 = math.tanh %215 : vector<64x8xf32>
    %c64_111 = arith.constant 64 : index
    %c16_112 = arith.constant 16 : index
    %217 = vector.load %arg2[%c64_111, %c16_112] : memref<224x128xf32, #tpu.memory_space<vmem>>, vector<1x32xf32>
    %218 = vector.extract_strided_slice %216 {offsets = [0, 0], sizes = [32, 8], strides = [1, 1]} : vector<64x8xf32> to vector<32x8xf32>
    %cst_113 = arith.constant dense<0.000000e+00> : vector<1x8xf32>
    %219 = tpu.matmul %217, %218, %cst_113 {dimension_numbers = #tpu.dot_dimension_numbers<[1], [0], [0], [1], [0, 0, 1, 1], [], []>} : vector<1x32xf32>, vector<32x8xf32>, vector<1x8xf32> -> vector<1x8xf32>
    %c64_114 = arith.constant 64 : index
    %c48_115 = arith.constant 48 : index
    %220 = vector.load %arg2[%c64_114, %c48_115] : memref<224x128xf32, #tpu.memory_space<vmem>>, vector<1x1xf32>
    %221 = vector.broadcast %220 : vector<1x1xf32> to vector<1x8xf32>
    %222 = arith.addf %219, %221 : vector<1x8xf32>
    %c65 = arith.constant 65 : index
    %c16_116 = arith.constant 16 : index
    %223 = vector.load %arg2[%c65, %c16_116] : memref<224x128xf32, #tpu.memory_space<vmem>>, vector<1x32xf32>
    %224 = vector.extract_strided_slice %216 {offsets = [32, 0], sizes = [32, 8], strides = [1, 1]} : vector<64x8xf32> to vector<32x8xf32>
    %cst_117 = arith.constant dense<0.000000e+00> : vector<1x8xf32>
    %225 = tpu.matmul %223, %224, %cst_117 {dimension_numbers = #tpu.dot_dimension_numbers<[1], [0], [0], [1], [0, 0, 1, 1], [], []>} : vector<1x32xf32>, vector<32x8xf32>, vector<1x8xf32> -> vector<1x8xf32>
    %c65_118 = arith.constant 65 : index
    %c48_119 = arith.constant 48 : index
    %226 = vector.load %arg2[%c65_118, %c48_119] : memref<224x128xf32, #tpu.memory_space<vmem>>, vector<1x1xf32>
    %227 = vector.broadcast %226 : vector<1x1xf32> to vector<1x8xf32>
    %228 = arith.addf %225, %227 : vector<1x8xf32>
    "tpu.trace_start"() <{level = 10 : i32, message = "dm,jm->dj"}> : () -> ()
    %cst_120 = arith.constant dense<0.000000e+00> : vector<1x2xf32>
    %229 = tpu.matmul %228, %4, %cst_120 {dimension_numbers = #tpu.dot_dimension_numbers<[1], [1], [0], [0], [0, 0, 1, 0], [], []>} : vector<1x8xf32>, vector<2x8xf32>, vector<1x2xf32> -> vector<1x2xf32>
    "tpu.trace_stop"() : () -> ()
    %cst_121 = arith.constant dense<0.000000e+00> : vector<1x8xf32>
    %230 = tpu.matmul %229, %4, %cst_121 {dimension_numbers = #tpu.dot_dimension_numbers<[1], [0], [0], [1], [0, 0, 1, 1], [], []>} : vector<1x2xf32>, vector<2x8xf32>, vector<1x8xf32> -> vector<1x8xf32>
    %cst_122 = arith.constant 4.000000e+00 : f32
    %231 = vector.broadcast %cst_122 : f32 to vector<1x8xf32>
    %232 = arith.mulf %230, %231 : vector<1x8xf32>
    %c0_123 = arith.constant 0 : index
    %c0_124 = arith.constant 0 : index
    %233 = vector.load %arg7[%c0_123, %c0_124] : memref<1x8xf32, #tpu.memory_space<vmem>>, vector<1x8xf32>
    tpu.vector_store %arg7[%c0_123, %c0_124], %232 {strides = array<i32>} : memref<1x8xf32, #tpu.memory_space<vmem>>, vector<1x8xf32>,
    %c0_125 = arith.constant 0 : index
    %c0_126 = arith.constant 0 : index
    %c0_127 = arith.constant 0 : index
    %234 = vector.load %arg3[%c0_125, %c0_126, %c0_127] : memref<1x2x8xf32, #tpu.memory_space<vmem>>, vector<1x1x8xf32>
    %235 = vector.shape_cast %234 : vector<1x1x8xf32> to vector<1x8xf32>
    %236 = vector.shape_cast %222 : vector<1x8xf32> to vector<1x1x8xf32>
    tpu.vector_store %arg3[%c0_125, %c0_126, %c0_127], %236 {strides = array<i32>} : memref<1x2x8xf32, #tpu.memory_space<vmem>>, vector<1x1x8xf32>,
    %c0_128 = arith.constant 0 : index
    %c0_129 = arith.constant 0 : index
    %237 = vector.load %arg7[%c0_128, %c0_129] : memref<1x8xf32, #tpu.memory_space<vmem>>, vector<1x8xf32>
    %c0_130 = arith.constant 0 : index
    %c1 = arith.constant 1 : index
    %c0_131 = arith.constant 0 : index
    %238 = vector.load %arg3[%c0_130, %c1, %c0_131] : memref<1x2x8xf32, #tpu.memory_space<vmem>>, vector<1x1x8xf32>
    %239 = vector.shape_cast %238 : vector<1x1x8xf32> to vector<1x8xf32>
    %240 = vector.shape_cast %237 : vector<1x8xf32> to vector<1x1x8xf32>
    tpu.vector_store %arg3[%c0_130, %c1, %c0_131], %240 {strides = array<i32>} : memref<1x2x8xf32, #tpu.memory_space<vmem>>, vector<1x1x8xf32>,
    return
  }
  func.func @transform_0(%arg0: i32) -> (i32, i32, i32) {
    %c0_i32 = arith.constant 0 : i32
    %c0_i32_0 = arith.constant 0 : i32
    %c0_i32_1 = arith.constant 0 : i32
    return %arg0, %c0_i32, %c0_i32_0 : i32, i32, i32
  }
  func.func @transform_1(%arg0: i32) -> (i32, i32) {
    %c0_i32 = arith.constant 0 : i32
    %c0_i32_0 = arith.constant 0 : i32
    %c0_i32_1 = arith.constant 0 : i32
    return %c0_i32, %c0_i32_0 : i32, i32
  }
  func.func @transform_2(%arg0: i32) -> (i32, i32, i32) {
    %c0_i32 = arith.constant 0 : i32
    %c0_i32_0 = arith.constant 0 : i32
    %c0_i32_1 = arith.constant 0 : i32
    return %arg0, %c0_i32, %c0_i32_0 : i32, i32, i32
  }
}

</mosaic_0001>

<bundles_post_ra>
// kernel: squeeze.81
= control target key start
LH: loop header
LB: loop body
LE: loop exit
PB: predicated region body
PF: predicated region fallthrough
CT: control target
= control target key end

     0   :  { %vm7_vm0 = vcmask 31744   ;;  %s39_s0 = inlined_call_operand.vmem [shape: f32[8], index: 0, kind: input, shape index: {}]   ;;  %s40_s1 = inlined_call_operand.vmem [shape: f32[2,4], index: 1, kind: output, shape index: {}]  }
   0x1   :  { %v4_v0 = vld [vmem:[%s39_s0] sm:$0x1]  ;;  %s22_s0 = smov 124  }
   0x2   :  { %5 = vst [vmem:[#allocation1] sm:$0x1] %v4_v0 }
   0x9   :  { %v9_v1 = vld [vmem:[#allocation1] sm:$0x1]  }
   0xa   :  { %v6_v2 = vld [vmem:[#allocation1] sm:$0x1]   ;;  %10 = vrot.lane.b32.xlu0 %v9_v1, %s22_s0 }
   0xb   :  { %8 = vst.msk [vmem:[#allocation0] sm:$0x1] %vm7_vm0, %v6_v2  }
  0x7c   :  { %v11_v3 = vpop.permute.xlu0 %10  }
  0x7d   :  { %14 = vst.msk [vmem:[#allocation0 + $0x1] sm:$0x1] %vm7_vm0, %v11_v3  }
  0x84   :  { %v18_v4 = vld [vmem:[#allocation0] sm:$0x3] }
  0x85   :  { %20 = vst [vmem:[%s40_s1] sm:$0x3] %v18_v4 }

// kernel: actor_forward.1
= control target key start
LH: loop header
LB: loop body
LE: loop exit
PB: predicated region body
PF: predicated region fallthrough
CT: control target
= control target key end

     0   :  { %vm35_vm0 = vcmask 1043456   ;;  %v2701_v1 = vmov 0.0   ;;  %vm2702_vm1 = vmmov 0   ;;  %s2703_s13 = smov 72   ;;  %v2704_v4 = vmov 60   ;;  %s2709_s12 = smov 112   ;;  %s3114_s1 = inlined_call_operand.vmem [shape: f32[224,128], index: 1, kind: input, shape index: {}]   ;;  %s3115_s0 = inlined_call_operand.vmem [shape: f32[1,24,64], index: 0, kind: input, shape index: {}]   ;;  %s3116_s2 = inlined_call_operand.vmem [shape: f32[1,2,8], index: 2, kind: output, shape index: {}]  }
   0x1   :  { %v23_v0 = vld [vmem:[%s3114_s1 + $0x40] sm:$0xff]  ;;  %2385 = vmatprep.subr.mxu0 %v2701_v1  ;;  %2387 = vmatprep.mubr.msk.f32.mxu0 %vm2702_vm1, %v2701_v1  ;;  %v2705_v5 = vmov 88   ;;  %v2706_v6 = vmov 89   ;;  %vm32_vm2 = vcmask 31744   ;;  %v2707_v8 = vmov 8   ;;  %v2760_v9 = vld [vmem:[%s3114_s1 + $0x8] sm:$0xff] }
   0x2   :  { %v24_v2 = vld [vmem:[%s3115_s0] sm:$0xf]  ;;  %30 = vrot.lane.b32.xlu0 %v23_v0, %s2703_s13  ;;  %2617 = vset.pattern.permute.xlu1 %v2705_v5  ;;  %v109_v12 = vld [vmem:[%s3115_s0 + $0x4] sm:$0xff]  ;;  %vm115_vm3 = vcmask 523264   ;;  %vm163_vm4 = vcmask 64512   ;;  %v2796_v57 = vld [vmem:[%s3114_s1 + $0x10] sm:$0xff] }
   0x3   :  { %2386 = vmatpush3.msk.msra.mxu0 %vm35_vm0, %v24_v2  ;;  %v2746_v3 = vld [vmem:[%s3114_s1] sm:$0xff]  ;;  %2616 = vset.pattern.permute.xlu0 %v2704_v4  ;;  %v2256_v58 = vld [vmem:[%s3115_s0 + $0xc] ss:$0 sm:$0xff]  ;;  %vm2851_vm5 = vmpackc.low %vm115_vm3, %vm115_vm3  ;;  %s2713_s13 = smov 96   ;;  %s2715_s16 = smov 80   ;;  %vm862_vm6 = vcmask 261120  }
   0x4   :  { %140 = vperm.xlu1 %2617, %v2746_v3   ;;  %2390 = vmatprep.subr.mxu1 %v2701_v1  ;;  %v11_v59 = vld [vmem:[%s3114_s1 + $0x80] sm:$0xff]  ;;  %v12_v60 = vld [vmem:[%s3114_s1 + $0x88] sm:$0xff]  ;;  %vm2160_vm7 = vcmask 1041408   ;;  %vm2234_vm8 = vcmask 57344   ;;  %vm2156_vm9 = vcmask 15360  }
   0x5   :  { %2392 = vmatprep.mubr.msk.f32.mxu1 %vm2702_vm1, %v2701_v1  ;;  %v424_v62 = vadd.f32 %v2256_v58, %v11_v59  ;;  %v425_v4 = vadd.f32 %v2256_v58, %v12_v60 }
   0x6   :  { %27 = vperm.xlu0 %2616, %v23_v0  }
   0x8   :  { %2618 = vset.pattern.permute.xlu1 %v2706_v6 }
   0x9   :  { %145 = vperm.xlu1 %2618, %v2746_v3  }
   0xa   :  { %2620 = vset.pattern.permute.xlu0 %v2707_v8 }
   0xb   :  { %155 = vperm.xlu0 %2620, %v2760_v9  }
   0xd   :  { %2619 = vset.pattern.permute.xlu1 %v2707_v8 }
   0xe   :  { %150 = vperm.xlu1 %2619, %v2746_v3  }
  0x74   :  { %v31_v7 = vpop.permute.xlu0 %30 }
  0x75   :  { %2388 = vmatmul.mubr.msk.f32.vlgmr.msra.gmra.mrb[0].mxu0 %vm32_vm2, %v31_v7 }
  0x83   :  { %v141_v35 = vpop.permute.xlu1 %140 }
  0x85   :  { %v28_v10 = vpop.permute.xlu0 %27 }
  0x88   :  { %v146_v38 = vpop.permute.xlu1 %145 }
  0x8a   :  { %v156_v45 = vpop.permute.xlu0 %155 }
  0x8d   :  { %v151_v41 = vpop.permute.xlu1 %150 }
 0x148   :  { %v105_v11 = vpop.f32.mrb[0].mxu0 }
 0x149   :  { %v106_v13 = vadd.f32 %v105_v11, %v28_v10  ;;  %v2389_v14 = vpop.f32.mrb[1].mxu0  ;;  %v14_v10 = vld [vmem:[%s3114_s1 + $0x98] sm:$0xff]  ;;  %v13_v11 = vld [vmem:[%s3114_s1 + $0x90] sm:$0xff] }
 0x14a   :  { %v427_v14 = vadd.f32 %v2256_v58, %v14_v10 }
 0x14b   :  { %v2768_v15 = vadd.f32 %v109_v12, %v106_v13 }
 0x14d   :  { %v116_v16 = vsel %vm115_vm3, %v2768_v15, 0.0 }
 0x14e   :  { %v117_v17 = vrot.slane %v116_v16, 4 }
 0x150   :  { %v118_v18 = vadd.f32 %v117_v17, %v116_v16  ;;  %v426_v17 = vadd.f32 %v2256_v58, %v13_v11 }
 0x152   :  { %v119_v19 = vrot.slane %v118_v18, 2 }
 0x154   :  { %v120_v20 = vadd.f32 %v119_v19, %v118_v18 }
 0x156   :  { %v121_v21 = vrot.slane %v120_v20, 1 }
 0x158   :  { %v122_v22 = vadd.f32 %v121_v21, %v120_v20 }
 0x15a   :  { %v124_v23 = vmul.f32 0.125, %v122_v22 }
 0x15c   :  { %v125_v24 = vsub.f32 %v2768_v15, %v124_v23 }
 0x15e   :  { %v126_v25 = vmul.f32 %v125_v24, %v125_v24 }
 0x160   :  { %v127_v26 = vsel %vm115_vm3, %v126_v25, 0.0 }
 0x161   :  { %v128_v27 = vrot.slane %v127_v26, 4 }
 0x163   :  { %v129_v28 = vadd.f32 %v128_v27, %v127_v26  ;;  %v15_v27 = vld [vmem:[%s3114_s1 + $0xa0] sm:$0xff] }
 0x165   :  { %v130_v29 = vrot.slane %v129_v28, 2 }
 0x167   :  { %v131_v30 = vadd.f32 %v130_v29, %v129_v28 }
 0x169   :  { %v132_v31 = vrot.slane %v131_v30, 1 }
 0x16b   :  { %v133_v32 = vadd.f32 %v132_v31, %v131_v30 }
 0x16d   :  { %v134_v33 = vmul.f32 0.125, %v133_v32  ;;  %v428_v32 = vadd.f32 %v2256_v58, %v15_v27 }
 0x16f   :  { %v135_v34 = vadd.f32 1e-05, %v134_v33 }
 0x171   :  { %2641 = vrsqrt.f32 %v135_v34 }
 0x17b   :  { %v2642_v36 = vpop.eup %2641 }
 0x17c   :  { %v137_v37 = vmul.f32 %v2642_v36, %v125_v24  ;;  %v16_v24 = vld [vmem:[%s3114_s1 + $0xa8] sm:$0xff] }
 0x17d   :  { %v429_v28 = vadd.f32 %v2256_v58, %v16_v24 }
 0x17e   :  { %v143_v39 = vmul.f32 %v141_v35, %v137_v37  ;;  %v17_v37 = vld [vmem:[%s3114_s1 + $0xb0] sm:$0xff] }
 0x180   :  { %v148_v40 = vadd.f32 %v146_v38, %v143_v39  ;;  %v18_v38 = vld [vmem:[%s3114_s1 + $0xb8] sm:$0xff] }
 0x182   :  { %2391 = vmatpush3.msra.mxu1 %v148_v40  ;;  %v430_v40 = vadd.f32 %v2256_v58, %v17_v37 }
 0x183   :  { %2393 = vmatmul.mubr.msk.f32.vlgmr.msra.gmra.mrb[0].mxu1 %vm163_vm4, %v2746_v3 }
 0x184   :  { %2395 = vmatprep.mubr.msk.f32.mxu1 %vm2702_vm1, %v2701_v1 }
 0x187   :  { %2396 = vmatmul.mubr.msk.f32.gmra.mrb[2].mxu1 %vm163_vm4, %v2760_v9 }
 0x188   :  { %2398 = vmatprep.mubr.msk.f32.mxu1 %vm2702_vm1, %v2701_v1 }
 0x18b   :  { %2399 = vmatmul.mubr.msk.f32.gmra.mrb[4].mxu1 %vm163_vm4, %v2796_v57 }
 0x18c   :  { %2431 = vmatprep.mubr.msk.f32.mxu1 %vm2702_vm1, %v2701_v1 }
 0x256   :  { %v236_v42 = vpop.f32.mrb[0].mxu1 }
 0x257   :  { %v237_v43 = vadd.f32 %v236_v42, %v151_v41  ;;  %v2394_v44 = vpop.f32.mrb[1].mxu1 }
 0x259   :  { %250 = vxpose.xlu1.b32.start.end [1/1] (short) (narrow) %v237_v43, 64 }
 0x25a   :  { %v241_v46 = vpop.f32.mrb[2].mxu1 }
 0x25b   :  { %v242_v47 = vadd.f32 %v241_v46, %v156_v45  ;;  %v2397_v48 = vpop.f32.mrb[3].mxu1  ;;  %v431_v45 = vadd.f32 %v2256_v58, %v18_v38 }
 0x25d   :  { %2401 = vmatprep.subr.mxu0 %v242_v47 }
 0x25e   :  { %2402 = vmatpush3.msra.mxu0 %v242_v47 }
 0x25f   :  { %2434 = vmatprep.subr.mxu0 %v2701_v1 }
 0x2d9   :  { %v266_v49 = vpop.trf.xlu1 }
 0x2da   :  { %2403 = vmatprep.mubr.msk.f32.mxu0 %vm163_vm4, %v266_v49 }
 0x2dd   :  { %v267_v50 = vpop.trf.xlu1 }
 0x2de   :  { %2404 = vmatmul.mubr.msk.f32.vlgmr.msra.gmra.mrb[2].mxu0 %vm163_vm4, %v267_v50 }
 0x2e1   :  { %v268_v51 = vpop.trf.xlu1 }
 0x2e2   :  { %2406 = vmatprep.mubr.msk.f32.mxu0 %vm163_vm4, %v268_v51 }
 0x2e5   :  { %v269_v52 = vpop.trf.xlu1 }
 0x2e6   :  { %2407 = vmatmul.mubr.msk.f32.gmra.mrb[4].mxu0 %vm163_vm4, %v269_v52 }
 0x2e9   :  { %v270_v53 = vpop.trf.xlu1 }
 0x2ea   :  { %2409 = vmatprep.mubr.msk.f32.mxu0 %vm163_vm4, %v270_v53 }
 0x2ed   :  { %v271_v54 = vpop.trf.xlu1 }
 0x2ee   :  { %2410 = vmatmul.mubr.msk.f32.gmra.mrb[6].mxu0 %vm163_vm4, %v271_v54 }
 0x2f1   :  { %v272_v55 = vpop.trf.xlu1 }
 0x2f2   :  { %2412 = vmatprep.mubr.msk.f32.mxu0 %vm163_vm4, %v272_v55 }
 0x2f5   :  { %v273_v56 = vpop.trf.xlu1 }
 0x2f6   :  { %2413 = vmatmul.mubr.msk.f32.gmra.mrb[8].mxu0 %vm163_vm4, %v273_v56 }
 0x2f7   :  { %2436 = vmatprep.mubr.msk.f32.mxu0 %vm2702_vm1, %v2701_v1 }
 0x3b1   :  { %v2405_v61 = vpop.f32.mrb[2].mxu0 }
 0x3b2   :  { %v372_v63 = vpop.f32.mrb[3].mxu0  ;;  %v412_v0 = vmul.f32 0.35355338, %v2405_v61 }
 0x3b3   :  { %v411_v2 = vmul.f32 0.35355338, %v372_v63 }
 0x3b4   :  { %v433_v13 = vadd.f32 %v425_v4, %v412_v0 }
 0x3b5   :  { %v432_v7 = vadd.f32 %v424_v62, %v411_v2 }
 0x3b6   :  { %v443_v21 = vsel %vm115_vm3, %v433_v13, -inf }
 0x3b7   :  { %v440_v12 = vsel %vm115_vm3, %v432_v7, -inf }
 0x3b8   :  { %441 = vmax.xlane.f32.xlu0 %v440_v12 }
 0x3b9   :  { %v2408_v16 = vpop.f32.mrb[4].mxu0 }
 0x3ba   :  { %v414_v18 = vmul.f32 0.35355338, %v2408_v16  ;;  %v382_v19 = vpop.f32.mrb[5].mxu0 }
 0x3bb   :  { %v413_v20 = vmul.f32 0.35355338, %v382_v19 }
 0x3bc   :  { %444 = vmax.xlane.f32.xlu0 %v443_v21  ;;  %v435_v22 = vadd.f32 %v427_v14, %v414_v18 }
 0x3bd   :  { %v434_v23 = vadd.f32 %v426_v17, %v413_v20 }
 0x3be   :  { %v449_v25 = vsel %vm115_vm3, %v435_v22, -inf }
 0x3bf   :  { %v446_v26 = vsel %vm115_vm3, %v434_v23, -inf }
 0x3c0   :  { %450 = vmax.xlane.f32.xlu0 %v449_v25  ;;  %447 = vmax.xlane.f32.xlu1 %v446_v26 }
 0x3c1   :  { %v2411_v29 = vpop.f32.mrb[6].mxu0 }
 0x3c2   :  { %v416_v30 = vmul.f32 0.35355338, %v2411_v29  ;;  %v392_v31 = vpop.f32.mrb[7].mxu0 }
 0x3c3   :  { %v415_v33 = vmul.f32 0.35355338, %v392_v31 }
 0x3c4   :  { %v437_v34 = vadd.f32 %v429_v28, %v416_v30 }
 0x3c5   :  { %v436_v36 = vadd.f32 %v428_v32, %v415_v33 }
 0x3c6   :  { %v455_v35 = vsel %vm115_vm3, %v437_v34, -inf }
 0x3c7   :  { %456 = vmax.xlane.f32.xlu0 %v455_v35  ;;  %v452_v42 = vsel %vm115_vm3, %v436_v36, -inf  ;;  %v246_v35 = vpop.f32.mrb[4].mxu1 }
 0x3c9   :  { %v2414_v39 = vpop.f32.mrb[8].mxu0 }
 0x3ca   :  { %v402_v41 = vpop.f32.mrb[9].mxu0  ;;  %v418_v43 = vmul.f32 0.35355338, %v2414_v39 }
 0x3cb   :  { %v417_v44 = vmul.f32 0.35355338, %v402_v41  ;;  %453 = vmax.xlane.f32.xlu0 %v452_v42 }
 0x3cc   :  { %v439_v48 = vadd.f32 %v431_v45, %v418_v43 }
 0x3cd   :  { %v438_v46 = vadd.f32 %v430_v40, %v417_v44 }
 0x3ce   :  { %v461_v49 = vsel %vm115_vm3, %v439_v48, -inf }
 0x3cf   :  { %v458_v47 = vsel %vm115_vm3, %v438_v46, -inf }
 0x3d0   :  { %459 = vmax.xlane.f32.xlu0 %v458_v47 }
 0x3d1   :  { %627 = vrot.lane.b32.xlu1 %v2746_v3, %s2709_s12 }
 0x3d4   :  { %462 = vmax.xlane.f32.xlu0 %v461_v49 }
 0x445   :  { %v442_v50 = vpop.xlane.xlu0 %441 }
 0x446   :  { %v464_v51 = vsub.f32 %v432_v7, %v442_v50 }
 0x448   :  { %v472_v54 = vmul.f32 1.442695, %v464_v51 }
 0x449   :  { %v445_v52 = vpop.xlane.xlu0 %444 }
 0x44a   :  { %v465_v53 = vsub.f32 %v433_v13, %v445_v52 }
 0x44c   :  { %v474_v55 = vmul.f32 1.442695, %v465_v53 }
 0x44d   :  { %v451_v56 = vpop.xlane.xlu0 %450  ;;  %v448_v59 = vpop.xlane.xlu1 %447 }
 0x44e   :  { %2643 = vpow2.f32 %v474_v55  ;;  %v467_v60 = vsub.f32 %v435_v22, %v451_v56  ;;  %v466_v61 = vsub.f32 %v434_v23, %v448_v59 }
 0x44f   :  { %2645 = vpow2.f32 %v472_v54 }
 0x450   :  { %v478_v58 = vmul.f32 1.442695, %v467_v60  ;;  %v476_v62 = vmul.f32 1.442695, %v466_v61 }
 0x452   :  { %2647 = vpow2.f32 %v478_v58 }
 0x453   :  { %2649 = vpow2.f32 %v476_v62 }
 0x454   :  { %v457_v63 = vpop.xlane.xlu0 %456 }
 0x455   :  { %v469_v0 = vsub.f32 %v437_v34, %v457_v63  ;;  %v2708_v34 = vmov 0.0|0.0  }
 0x456   :  { %2559 = vmatprep.subr.bf16.mxu1 %v2708_v34 }
 0x457   :  { %v482_v4 = vmul.f32 1.442695, %v469_v0 }
 0x458   :  { %v2644_v2 = vpop.eup %2643  ;;  %v454_v10 = vpop.xlane.xlu0 %453 }
 0x459   :  { %v468_v7 = vsub.f32 %v436_v36, %v454_v10  ;;  %v491_v11 = vsel %vm115_vm3, %v2644_v2, 0.0  ;;  %v2646_v12 = vpop.eup %2645  ;;  %2651 = vpow2.f32 %v482_v4  ;;  %v2400_v36 = vpop.f32.mrb[5].mxu1 }
 0x45a   :  { %492 = vadd.xlane.f32.xlu0 %v491_v11  ;;  %v488_v16 = vsel %vm115_vm3, %v2646_v12, 0.0  ;;  %v2710_v11 = vmov 24  }
 0x45b   :  { %v480_v13 = vmul.f32 1.442695, %v468_v7 }
 0x45c   :  { %v2648_v17 = vpop.eup %2647 }
 0x45d   :  { %v460_v14 = vpop.xlane.xlu0 %459  ;;  %2653 = vpow2.f32 %v480_v13  ;;  %v497_v20 = vsel %vm115_vm3, %v2648_v17, 0.0  ;;  %v2650_v21 = vpop.eup %2649  ;;  %v2712_v13 = vmov 90  }
 0x45e   :  { %489 = vadd.xlane.f32.xlu0 %v488_v16  ;;  %v470_v18 = vsub.f32 %v438_v46, %v460_v14  ;;  %v494_v25 = vsel %vm115_vm3, %v2650_v21, 0.0  ;;  %v114_v14 = vld [vmem:[%s3114_s1 + $0x18] sm:$0xff] }
 0x460   :  { %v484_v23 = vmul.f32 1.442695, %v470_v18  ;;  %v628_v18 = vpop.permute.xlu1 %627 }
 0x461   :  { %v463_v19 = vpop.xlane.xlu0 %462 }
 0x462   :  { %v471_v22 = vsub.f32 %v439_v48, %v463_v19  ;;  %498 = vadd.xlane.f32.xlu0 %v497_v20 }
 0x463   :  { %v2652_v26 = vpop.eup %2651 }
 0x464   :  { %v486_v24 = vmul.f32 1.442695, %v471_v22  ;;  %v503_v27 = vsel %vm115_vm3, %v2652_v26, 0.0  ;;  %v2714_v22 = vmov 40  }
 0x466   :  { %2655 = vpow2.f32 %v486_v24  ;;  %495 = vadd.xlane.f32.xlu0 %v494_v25 }
 0x467   :  { %2657 = vpow2.f32 %v484_v23  ;;  %v2654_v28 = vpop.eup %2653 }
 0x468   :  { %v500_v29 = vsel %vm115_vm3, %v2654_v28, 0.0 }
 0x46a   :  { %504 = vadd.xlane.f32.xlu0 %v503_v27 }
 0x46e   :  { %501 = vadd.xlane.f32.xlu0 %v500_v29 }
 0x470   :  { %v2656_v30 = vpop.eup %2655 }
 0x471   :  { %v509_v31 = vsel %vm115_vm3, %v2656_v30, 0.0  ;;  %v2658_v32 = vpop.eup %2657 }
 0x472   :  { %510 = vadd.xlane.f32.xlu0 %v509_v31  ;;  %v506_v33 = vsel %vm115_vm3, %v2658_v32, 0.0 }
 0x476   :  { %507 = vadd.xlane.f32.xlu0 %v506_v33 }
 0x48c   :  { %160 = vperm.xlu0 %2620, %v2796_v57  }
 0x490   :  { %2621 = vset.pattern.permute.xlu0 %v2710_v11 }
 0x491   :  { %703 = vperm.xlu0 %2621, %v2746_v3  }
 0x495   :  { %2622 = vset.pattern.permute.xlu0 %v2712_v13 }
 0x496   :  { %729 = vperm.xlu0 %2622, %v2746_v3  }
 0x49a   :  { %757 = vrot.lane.b32.xlu0 %v2760_v9, %s2713_s13 }
 0x49b   :  { %2625 = vset.pattern.permute.xlu0 %v2714_v22 }
 0x49e   :  { %761 = vrot.lane.b32.xlu0 %v114_v14, %s2713_s13 }
 0x4a2   :  { %743 = vperm.xlu0 %2625, %v2760_v9  }
 0x4a6   :  { %860 = vrot.lane.b32.xlu0 %v2746_v3, %s2715_s16 }
 0x4a7   :  { %2627 = vset.pattern.permute.xlu0 %v2705_v5 }
 0x4e7   :  { %v493_v37 = vpop.xlane.xlu0 %492 }
 0x4e8   :  { %2659 = vrcp.f32 %v493_v37 }
 0x4eb   :  { %v490_v38 = vpop.xlane.xlu0 %489 }
 0x4ec   :  { %2661 = vrcp.f32 %v490_v38 }
 0x4ef   :  { %v499_v39 = vpop.xlane.xlu0 %498 }
 0x4f0   :  { %2663 = vrcp.f32 %v499_v39 }
 0x4f2   :  { %v2660_v41 = vpop.eup %2659 }
 0x4f3   :  { %v496_v40 = vpop.xlane.xlu0 %495  ;;  %v521_v43 = vmul.f32 %v2660_v41, %v2644_v2 }
 0x4f4   :  { %2665 = vrcp.f32 %v496_v40 }
 0x4f6   :  { %v2662_v42 = vpop.eup %2661 }
 0x4f7   :  { %v520_v44 = vmul.f32 %v2662_v42, %v2646_v12  ;;  %v505_v45 = vpop.xlane.xlu0 %504  ;;  %v2711_v12 = vmov 91  }
 0x4f8   :  { %2667 = vrcp.f32 %v505_v45  ;;  %2623 = vset.pattern.permute.xlu1 %v2711_v12 }
 0x4f9   :  { %v2560_v47 = vpack.c.bf16 %v521_v43, %v520_v44  ;;  %734 = vperm.xlu1 %2623, %v2746_v3  }
 0x4fa   :  { %v2664_v49 = vpop.eup %2663 }
 0x4fb   :  { %2562 = vmatpush3.bf16.xpose.msk.msra.mxu1 %vm2851_vm5, %v2560_v47  ;;  %v502_v48 = vpop.xlane.xlu0 %501  ;;  %v523_v51 = vmul.f32 %v2664_v49, %v2648_v17 }
 0x4fc   :  { %2669 = vrcp.f32 %v502_v48  ;;  %2563 = vmatprep.subr.bf16.mxu1 %v2708_v34 }
 0x4fd   :  { %755 = vrot.lane.b32.xlu1 %v2746_v3, %s2713_s13 }
 0x4fe   :  { %v2666_v50 = vpop.eup %2665  ;;  %2624 = vset.pattern.permute.xlu1 %v2714_v22 }
 0x4ff   :  { %v522_v52 = vmul.f32 %v2666_v50, %v2650_v21  ;;  %v511_v53 = vpop.xlane.xlu0 %510 }
 0x500   :  { %2671 = vrcp.f32 %v511_v53 }
 0x501   :  { %v2564_v54 = vpack.c.bf16 %v523_v51, %v522_v52  ;;  %759 = vrot.lane.b32.xlu1 %v2796_v57, %s2713_s13  ;;  %v2716_v52 = vmov 80  }
 0x502   :  { %v2668_v56 = vpop.eup %2667 }
 0x503   :  { %2566 = vmatpush3.bf16.xpose.msk.msra.mxu1 %vm2851_vm5, %v2564_v54  ;;  %v508_v55 = vpop.xlane.xlu0 %507  ;;  %v525_v60 = vmul.f32 %v2668_v56, %v2652_v26 }
 0x504   :  { %2673 = vrcp.f32 %v508_v55  ;;  %2567 = vmatprep.subr.bf16.mxu1 %v2708_v34 }
 0x505   :  { %739 = vperm.xlu1 %2624, %v2746_v3  }
 0x506   :  { %v2670_v59 = vpop.eup %2669 }
 0x507   :  { %v524_v58 = vmul.f32 %v2670_v59, %v2654_v28 }
 0x509   :  { %v2568_v61 = vpack.c.bf16 %v525_v60, %v524_v58  ;;  %747 = vperm.xlu1 %2624, %v2796_v57  }
 0x50a   :  { %v2672_v62 = vpop.eup %2671 }
 0x50b   :  { %2570 = vmatpush3.bf16.xpose.msk.msra.mxu1 %vm2851_vm5, %v2568_v61  ;;  %v527_v0 = vmul.f32 %v2672_v62, %v2656_v30  ;;  %v161_v10 = vpop.permute.xlu0 %160 }
 0x50c   :  { %2571 = vmatprep.subr.bf16.mxu1 %v2708_v34  ;;  %v247_v7 = vadd.f32 %v246_v35, %v161_v10 }
 0x50d   :  { %752 = vperm.xlu1 %2624, %v114_v14  }
 0x50e   :  { %v2674_v63 = vpop.eup %2673 }
 0x50f   :  { %v526_v2 = vmul.f32 %v2674_v63, %v2658_v32 }
 0x510   :  { %v704_v24 = vpop.permute.xlu0 %703 }
 0x511   :  { %v2572_v4 = vpack.c.bf16 %v527_v0, %v526_v2  ;;  %2626 = vset.pattern.permute.xlu1 %v2716_v52 }
 0x512   :  { %937 = vperm.xlu1 %2626, %v2746_v3  }
 0x513   :  { %2574 = vmatpush3.bf16.xpose.msk.msra.mxu1 %vm2851_vm5, %v2572_v4 }
 0x514   :  { %2463 = vmatprep.subr.mxu1 %v2701_v1 }
 0x515   :  { %v730_v45 = vpop.permute.xlu0 %729 }
 0x516   :  { %2628 = vset.pattern.permute.xlu1 %v2706_v6 }
 0x519   :  { %v758_v48 = vpop.permute.xlu0 %757 }
 0x51a   :  { %2432 = vmatmul.mubr.msk.f32.vlgmr.msra.gmra.mrb[6].mxu1 %vm115_vm3, %v247_v7 }
 0x51b   :  { %2465 = vmatprep.mubr.msk.f32.mxu1 %vm2702_vm1, %v2701_v1 }
 0x51d   :  { %v762_v51 = vpop.permute.xlu0 %761 }
 0x521   :  { %v744_v55 = vpop.permute.xlu0 %743 }
 0x525   :  { %v861_v6 = vpop.permute.xlu0 %860 }
 0x578   :  { %v735_v20 = vpop.permute.xlu1 %734 }
 0x57c   :  { %v756_v21 = vpop.permute.xlu1 %755 }
 0x580   :  { %v760_v50 = vpop.permute.xlu1 %759 }
 0x584   :  { %v740_v53 = vpop.permute.xlu1 %739 }
 0x588   :  { %v748_v54 = vpop.permute.xlu1 %747 }
 0x58c   :  { %v753_v62 = vpop.permute.xlu1 %752 }
 0x5ed   :  { %v621_v16 = vpop.f32.mrb[6].mxu1 }
 0x5ee   :  { %625 = vst.msk [vmem:[#allocation2] sm:$0xff] %vm115_vm3, %v621_v16  ;;  %v2433_v17 = vpop.f32.mrb[7].mxu1 }
 0x5ef   :  { %v21_v17 = vld [vmem:[%s3114_s1 + $0xc8] sm:$0xff] }
 0x5f5   :  { %v626_v19 = vld [vmem:[#allocation2] sm:$0xff] }
 0x5f6   :  { %2435 = vmatpush3.msra.mxu0 %v626_v19 }
 0x5f7   :  { %2437 = vmatmul.mubr.msk.f32.vlgmr.msra.gmra.mrb[10].mxu0 %vm163_vm4, %v628_v18  ;;  %v2926_v18 = vld [vmem:[%s3114_s1 + $0x20] sm:$0xff] }
 0x5f8   :  { %2441 = vmatprep.mubr.msk.f32.mxu0 %vm163_vm4, %v756_v21  ;;  %1046 = vperm.xlu0 %2627, %v2926_v18  }
 0x5f9   :  { %1051 = vperm.xlu1 %2628, %v2926_v18  }
 0x5fc   :  { %2630 = vset.pattern.permute.xlu0 %v2707_v8 }
 0x5fd   :  { %2629 = vset.pattern.permute.xlu1 %v2707_v8 }
 0x5fe   :  { %1056 = vperm.xlu1 %2629, %v2926_v18  }
 0x6ca   :  { %v697_v23 = vpop.f32.mrb[10].mxu0 }
 0x6cb   :  { %v701_v25 = vadd.f32 %v697_v23, %v2768_v15  ;;  %v2438_v26 = vpop.f32.mrb[11].mxu0 }
 0x6cd   :  { %v2898_v27 = vadd.f32 %v704_v24, %v701_v25  ;;  %v2940_v25 = vld [vmem:[%s3114_s1 + $0x28] sm:$0xff] }
 0x6ce   :  { %1061 = vperm.xlu0 %2630, %v2940_v25  }
 0x6cf   :  { %v707_v28 = vsel %vm115_vm3, %v2898_v27, 0.0 }
 0x6d0   :  { %v708_v9 = vrot.slane %v707_v28, 4 }
 0x6d2   :  { %v709_v29 = vadd.f32 %v708_v9, %v707_v28  ;;  %2631 = vset.pattern.permute.xlu0 %v2710_v11 }
 0x6d4   :  { %v710_v57 = vrot.slane %v709_v29, 2 }
 0x6d6   :  { %v711_v30 = vadd.f32 %v710_v57, %v709_v29 }
 0x6d8   :  { %v712_v31 = vrot.slane %v711_v30, 1 }
 0x6da   :  { %v713_v32 = vadd.f32 %v712_v31, %v711_v30 }
 0x6dc   :  { %v714_v33 = vmul.f32 0.125, %v713_v32 }
 0x6de   :  { %v715_v5 = vsub.f32 %v2898_v27, %v714_v33 }
 0x6e0   :  { %v716_v35 = vmul.f32 %v715_v5, %v715_v5 }
 0x6e2   :  { %v717_v36 = vsel %vm115_vm3, %v716_v35, 0.0 }
 0x6e3   :  { %v718_v37 = vrot.slane %v717_v36, 4 }
 0x6e5   :  { %v719_v15 = vadd.f32 %v718_v37, %v717_v36 }
 0x6e7   :  { %v720_v38 = vrot.slane %v719_v15, 2 }
 0x6e9   :  { %v721_v39 = vadd.f32 %v720_v38, %v719_v15 }
 0x6eb   :  { %v722_v40 = vrot.slane %v721_v39, 1 }
 0x6ed   :  { %v723_v41 = vadd.f32 %v722_v40, %v721_v39 }
 0x6ef   :  { %v724_v42 = vmul.f32 0.125, %v723_v41 }
 0x6f1   :  { %v725_v43 = vadd.f32 1e-05, %v724_v42 }
 0x6f3   :  { %2675 = vrsqrt.f32 %v725_v43 }
 0x6fd   :  { %v2676_v44 = vpop.eup %2675 }
 0x6fe   :  { %v727_v46 = vmul.f32 %v2676_v44, %v715_v5 }
 0x700   :  { %v732_v47 = vmul.f32 %v730_v45, %v727_v46  ;;  %v1047_v45 = vpop.permute.xlu0 %1046 }
 0x702   :  { %v737_v49 = vadd.f32 %v735_v20, %v732_v47  ;;  %v938_v20 = vpop.permute.xlu1 %937 }
 0x704   :  { %2439 = vmatprep.subr.mxu0 %v737_v49 }
 0x705   :  { %2440 = vmatpush3.msra.mxu0 %v737_v49 }
 0x706   :  { %2442 = vmatmul.mubr.msk.f32.vlgmr.msra.gmra.mrb[12].mxu0 %vm163_vm4, %v758_v48  ;;  %2575 = vmatprep.subr.bf16.mxu0 %v2708_v34  ;;  %v1052_v47 = vpop.permute.xlu1 %1051 }
 0x707   :  { %2444 = vmatprep.mubr.msk.f32.mxu0 %vm163_vm4, %v760_v50  ;;  %v2963_v50 = vld [vmem:[%s3114_s1 + $0x30] sm:$0xff] }
 0x70a   :  { %2445 = vmatmul.mubr.msk.f32.gmra.mrb[14].mxu0 %vm163_vm4, %v762_v51  ;;  %v1057_v51 = vpop.permute.xlu1 %1056 }
 0x70b   :  { %2455 = vmatprep.mubr.msk.f32.mxu0 %vm2702_vm1, %v2701_v1 }
 0x7d9   :  { %v2443_v56 = vpop.f32.mrb[12].mxu0 }
 0x7da   :  { %v837_v59 = vpop.f32.mrb[13].mxu0  ;;  %v843_v60 = vadd.f32 %v2443_v56, %v744_v55  ;;  %v1062_v56 = vpop.permute.xlu0 %1061 }
 0x7db   :  { %v838_v58 = vadd.f32 %v837_v59, %v740_v53 }
 0x7dc   :  { %v857_v61 = vmax.f32 %v843_v60, 0.0 }
 0x7dd   :  { %v856_v63 = vmax.f32 %v838_v58, 0.0  ;;  %v2446_v0 = vpop.f32.mrb[14].mxu0 }
 0x7de   :  { %v853_v2 = vadd.f32 %v2446_v0, %v753_v62  ;;  %v847_v4 = vpop.f32.mrb[15].mxu0 }
 0x7df   :  { %v2576_v10 = vpack.c.bf16 %v857_v61, %v856_v63  ;;  %v848_v7 = vadd.f32 %v847_v4, %v748_v54  ;;  %v1261_v63 = vld [vmem:[%s3115_s0 + $0x10] sm:$0xf] }
 0x7e0   :  { %v859_v14 = vmax.f32 %v853_v2, 0.0 }
 0x7e1   :  { %v858_v16 = vmax.f32 %v848_v7, 0.0  ;;  %2577 = vmatpush3.bf16.msra.mxu0 %v2576_v10  ;;  %v19_v10 = vld [vmem:[%s3114_s1 + $0xc0] sm:$0xff] }
 0x7e2   :  { %2578 = vmatprep.subr.bf16.mxu0 %v2708_v34 }
 0x7e3   :  { %v2579_v3 = vpack.c.bf16 %v859_v14, %v858_v16 }
 0x7e5   :  { %2580 = vmatpush3.bf16.msra.mxu0 %v2579_v3 }
 0x7e6   :  { %2458 = vmatprep.subr.mxu0 %v2701_v1 }
 0x7e8   :  { %2456 = vmatmul.mubr.msk.f32.vlgmr.msra.gmra.mrb[16].mxu0 %vm862_vm6, %v861_v6 }
 0x7e9   :  { %2460 = vmatprep.mubr.msk.f32.mxu0 %vm2702_vm1, %v2701_v1 }
 0x7ee   :  { %2459 = vmatpush3.xpose.msk.msra.mxu0 %vm115_vm3, %v21_v17 }
 0x7ef   :  { %2474 = vmatprep.subr.mxu0 %v2701_v1 }
 0x8bb   :  { %v931_v19 = vpop.f32.mrb[16].mxu0 }
 0x8bc   :  { %v935_v21 = vadd.f32 %v931_v19, %v2898_v27  ;;  %v2457_v23 = vpop.f32.mrb[17].mxu0 }
 0x8be   :  { %v940_v24 = vadd.f32 %v938_v20, %v935_v21 }
 0x8c0   :  { %2461 = vmatmul.mubr.msk.f32.vlgmr.msra.gmra.mrb[18].mxu0 %vm115_vm3, %v940_v24 }
 0x8c1   :  { %2476 = vmatprep.mubr.msk.f32.mxu0 %vm2702_vm1, %v2701_v1 }
 0x993   :  { %v1013_v26 = vpop.f32.mrb[18].mxu0 }
 0x994   :  { %1017 = vst.msk [vmem:[#allocation3] sm:$0xff] %vm163_vm4, %v1013_v26  ;;  %v2462_v27 = vpop.f32.mrb[19].mxu0 }
 0x99b   :  { %v2945_v28 = vld [vmem:[#allocation3] sm:$0xff] }
 0x99c   :  { %v1023_v9 = vsel %vm163_vm4, %v2945_v28, 0.0 }
 0x99d   :  { %v1024_v29 = vrot.slane %v1023_v9, 4 }
 0x99f   :  { %v1025_v57 = vadd.f32 %v1024_v29, %v1023_v9 }
 0x9a1   :  { %v1026_v30 = vrot.slane %v1025_v57, 2 }
 0x9a3   :  { %v1027_v31 = vadd.f32 %v1026_v30, %v1025_v57 }
 0x9a5   :  { %v1028_v32 = vrot.slane %v1027_v31, 1 }
 0x9a7   :  { %v1029_v33 = vadd.f32 %v1028_v32, %v1027_v31 }
 0x9a9   :  { %v1030_v5 = vmul.f32 0.125, %v1029_v33 }
 0x9ab   :  { %v1031_v35 = vsub.f32 %v2945_v28, %v1030_v5 }
 0x9ad   :  { %v1032_v36 = vmul.f32 %v1031_v35, %v1031_v35 }
 0x9af   :  { %v1033_v11 = vsel %vm163_vm4, %v1032_v36, 0.0 }
 0x9b0   :  { %v1034_v37 = vrot.slane %v1033_v11, 4 }
 0x9b2   :  { %v1035_v15 = vadd.f32 %v1034_v37, %v1033_v11 }
 0x9b4   :  { %v1036_v38 = vrot.slane %v1035_v15, 2 }
 0x9b6   :  { %v1037_v39 = vadd.f32 %v1036_v38, %v1035_v15 }
 0x9b8   :  { %v1038_v40 = vrot.slane %v1037_v39, 1 }
 0x9ba   :  { %v1039_v41 = vadd.f32 %v1038_v40, %v1037_v39 }
 0x9bc   :  { %v1040_v42 = vmul.f32 0.125, %v1039_v41 }
 0x9be   :  { %v1041_v43 = vadd.f32 1e-05, %v1040_v42 }
 0x9c0   :  { %2677 = vrsqrt.f32 %v1041_v43 }
 0x9ca   :  { %v2678_v44 = vpop.eup %2677 }
 0x9cb   :  { %v1043_v46 = vmul.f32 %v2678_v44, %v1031_v35 }
 0x9cd   :  { %v1049_v48 = vmul.f32 %v1047_v45, %v1043_v46 }
 0x9cf   :  { %v1054_v49 = vadd.f32 %v1052_v47, %v1049_v48 }
 0x9d1   :  { %2464 = vmatpush3.msra.mxu1 %v1054_v49 }
 0x9d2   :  { %2466 = vmatmul.mubr.msk.f32.vlgmr.msra.gmra.mrb[8].mxu1 %vm163_vm4, %v2926_v18  ;;  %2489 = vmatprep.subr.mxu1 %v2701_v1 }
 0x9d3   :  { %2468 = vmatprep.mubr.msk.f32.mxu1 %vm2702_vm1, %v2701_v1 }
 0x9d6   :  { %2469 = vmatmul.mubr.msk.f32.gmra.mrb[10].mxu1 %vm163_vm4, %v2940_v25 }
 0x9d7   :  { %2471 = vmatprep.mubr.msk.f32.mxu1 %vm2702_vm1, %v2701_v1 }
 0x9da   :  { %2472 = vmatmul.mubr.msk.f32.gmra.mrb[12].mxu1 %vm163_vm4, %v2963_v50 }
 0x9db   :  { %2491 = vmatprep.mubr.msk.f32.mxu1 %vm2702_vm1, %v2701_v1 }
 0xaa5   :  { %v1141_v53 = vpop.f32.mrb[8].mxu1 }
 0xaa6   :  { %v1142_v54 = vadd.f32 %v1141_v53, %v1057_v51  ;;  %v2467_v55 = vpop.f32.mrb[9].mxu1 }
 0xaa8   :  { %1155 = vxpose.xlu1.b32.start.end [1/1] (short) (narrow) %v1142_v54, 8 }
 0xaa9   :  { %v1146_v59 = vpop.f32.mrb[10].mxu1 }
 0xaaa   :  { %v1147_v60 = vadd.f32 %v1146_v59, %v1062_v56  ;;  %v2470_v58 = vpop.f32.mrb[11].mxu1 }
 0xaac   :  { %2475 = vmatpush3.msra.mxu0 %v1147_v60 }
 0xaad   :  { %2479 = vmatprep.subr.mxu0 %v2701_v1  ;;  %v1151_v61 = vpop.f32.mrb[12].mxu1 }
 0xaae   :  { %v2473_v62 = vpop.f32.mrb[13].mxu1 }
 0xac6   :  { %1066 = vperm.xlu1 %2629, %v2963_v50  }
 0xaca   :  { %2632 = vset.pattern.permute.xlu1 %v2712_v13  ;;  %v20_v13 = vld [vmem:[%s3114_s1 + $0xd8] sm:$0xff] }
 0xacb   :  { %1531 = vperm.xlu1 %2632, %v2926_v18  }
 0xacf   :  { %1557 = vrot.lane.b32.xlu1 %v2926_v18, %s2713_s13 }
 0xad0   :  { %2635 = vset.pattern.permute.xlu1 %v2714_v22 }
 0xad3   :  { %1559 = vrot.lane.b32.xlu1 %v2940_v25, %s2713_s13 }
 0xb28   :  { %v1171_v0 = vpop.trf.xlu1 }
 0xb29   :  { %2477 = vmatmul.mubr.msk.f32.vlgmr.msra.gmra.mrb[20].mxu0 %vm163_vm4, %v1171_v0 }
 0xb2a   :  { %2480 = vmatpush3.msk.msra.mxu0 %vm35_vm0, %v1261_v63  ;;  %2481 = vmatprep.mubr.msk.f32.mxu0 %vm2702_vm1, %v2701_v1 }
 0xb2b   :  { %2484 = vmatprep.subr.mxu0 %v2701_v1 }
 0xb2d   :  { %2482 = vmatmul.mubr.msk.f32.vlgmr.msra.gmra.mrb[22].mxu0 %vm32_vm2, %v20_v13 }
 0xb2e   :  { %2486 = vmatprep.mubr.msk.f32.mxu0 %vm2702_vm1, %v2701_v1 }
 0xb45   :  { %v1067_v9 = vpop.permute.xlu1 %1066 }
 0xb46   :  { %v1152_v57 = vadd.f32 %v1151_v61, %v1067_v9  ;;  %v1743_v9 = vld [vmem:[%s3114_s1 + $0x40] sm:$0xff] }
 0xbfc   :  { %v1256_v2 = vpop.f32.mrb[20].mxu0 }
 0xbfd   :  { %v2478_v4 = vpop.f32.mrb[21].mxu0  ;;  %v1260_v14 = vmul.f32 0.35355338, %v1256_v2 }
 0xc00   :  { %v1334_v7 = vpop.f32.mrb[22].mxu0 }
 0xc01   :  { %v1338_v16 = vadd.f32 %v1334_v7, %v19_v10  ;;  %v2483_v3 = vpop.f32.mrb[23].mxu0 }
 0xc03   :  { %v1339_v6 = vadd.f32 %v1338_v16, %v1260_v14 }
 0xc05   :  { %v1340_v17 = vsel %vm163_vm4, %v1339_v6, -inf }
 0xc06   :  { %1341 = vmax.xlane.f32.xlu0 %v1340_v17 }
 0xc93   :  { %v1342_v19 = vpop.xlane.xlu0 %1341 }
 0xc94   :  { %v1343_v20 = vsub.f32 %v1339_v6, %v1342_v19 }
 0xc96   :  { %v1344_v21 = vmul.f32 1.442695, %v1343_v20 }
 0xc98   :  { %2679 = vpow2.f32 %v1344_v21 }
 0xca2   :  { %v2680_v23 = vpop.eup %2679 }
 0xca3   :  { %v1346_v24 = vsel %vm163_vm4, %v2680_v23, 0.0 }
 0xca4   :  { %1347 = vadd.xlane.f32.xlu0 %v1346_v24 }
 0xcba   :  { %1429 = vrot.lane.b32.xlu0 %v2926_v18, %s2709_s12 }
 0xcbe   :  { %1505 = vperm.xlu0 %2631, %v2926_v18  }
 0xcc2   :  { %2633 = vset.pattern.permute.xlu0 %v2711_v12  ;;  %v1022_v12 = vld [vmem:[%s3114_s1 + $0x38] sm:$0xff] }
 0xcc3   :  { %1536 = vperm.xlu0 %2633, %v2926_v18   ;;  %1563 = vrot.lane.b32.xlu1 %v1022_v12, %s2713_s13 }
 0xcc7   :  { %1561 = vrot.lane.b32.xlu0 %v2963_v50, %s2713_s13  ;;  %1545 = vperm.xlu1 %2635, %v2940_v25  }
 0xcc8   :  { %2634 = vset.pattern.permute.xlu0 %v2714_v22 }
 0xccb   :  { %1541 = vperm.xlu0 %2634, %v2926_v18   ;;  %1549 = vperm.xlu1 %2635, %v2963_v50  }
 0xccf   :  { %1554 = vperm.xlu0 %2634, %v1022_v12   ;;  %1662 = vrot.lane.b32.xlu1 %v2926_v18, %s2715_s16  ;;  %v1748_v12 = vld [vmem:[%s3114_s1 + $0x68] sm:$0xff] }
 0xcd0   :  { %2637 = vset.pattern.permute.xlu1 %v2707_v8 }
 0xcd3   :  { %2636 = vset.pattern.permute.xlu0 %v2716_v52  ;;  %v1532_v52 = vpop.permute.xlu1 %1531  ;;  %1753 = vperm.xlu1 %2637, %v1743_v9  }
 0xcd4   :  { %1738 = vperm.xlu0 %2636, %v2926_v18  }
 0xcd7   :  { %v1558_v25 = vpop.permute.xlu1 %1557 }
 0xcd8   :  { %2638 = vset.pattern.permute.xlu0 %v2707_v8 }
 0xcdb   :  { %v1560_v60 = vpop.permute.xlu1 %1559 }
 0xd31   :  { %v1348_v26 = vpop.xlane.xlu0 %1347 }
 0xd32   :  { %2681 = vrcp.f32 %v1348_v26 }
 0xd35   :  { %v1430_v31 = vpop.permute.xlu0 %1429  ;;  %v1564_v62 = vpop.permute.xlu1 %1563 }
 0xd3c   :  { %v2682_v27 = vpop.eup %2681 }
 0xd3d   :  { %v1350_v29 = vmul.f32 %v2682_v27, %v2680_v23  ;;  %v1506_v8 = vpop.permute.xlu0 %1505 }
 0xd3f   :  { %2485 = vmatpush3.xpose.msk.msra.mxu0 %vm163_vm4, %v1350_v29  ;;  %v1745_v29 = vld [vmem:[%s3114_s1 + $0x50] sm:$0xff] }
 0xd40   :  { %1763 = vperm.xlu0 %2638, %v1745_v29  }
 0xd42   :  { %2487 = vmatmul.mubr.msk.f32.vlgmr.msra.gmra.mrb[24].mxu0 %vm163_vm4, %v1152_v57  ;;  %v1537_v56 = vpop.permute.xlu0 %1536  ;;  %v1744_v57 = vld [vmem:[%s3114_s1 + $0x48] sm:$0xff] }
 0xd43   :  { %2496 = vmatprep.mubr.msk.f32.mxu0 %vm163_vm4, %v1558_v25  ;;  %1758 = vperm.xlu1 %2637, %v1744_v57   ;;  %v1920_v25 = vld [vmem:[%s3114_s1 + $0x40] sm:$0x1] }
 0xd44   :  { %1778 = vperm.xlu0 %2638, %v1748_v12  }
 0xd46   :  { %v1562_v61 = vpop.permute.xlu0 %1561  ;;  %v1546_v0 = vpop.permute.xlu1 %1545 }
 0xd4a   :  { %v1542_v63 = vpop.permute.xlu0 %1541  ;;  %v1550_v6 = vpop.permute.xlu1 %1549 }
 0xd4e   :  { %v1555_v3 = vpop.permute.xlu0 %1554  ;;  %v1663_v27 = vpop.permute.xlu1 %1662 }
 0xe15   :  { %v1423_v22 = vpop.f32.mrb[24].mxu0 }
 0xe16   :  { %1427 = vst.msk [vmem:[#allocation4] sm:$0xff] %vm163_vm4, %v1423_v22  ;;  %v2488_v30 = vpop.f32.mrb[25].mxu0  ;;  %v1746_v22 = vld [vmem:[%s3114_s1 + $0x58] sm:$0xff] }
 0xe17   :  { %1768 = vperm.xlu1 %2637, %v1746_v22   ;;  %v1750_v30 = vld [vmem:[%s3114_s1 + $0x78] sm:$0xff] }
 0xe18   :  { %1788 = vperm.xlu0 %2638, %v1750_v30  }
 0xe1d   :  { %v1428_v32 = vld [vmem:[#allocation4] sm:$0xff] }
 0xe1e   :  { %2490 = vmatpush3.msra.mxu1 %v1428_v32  ;;  %v2000_v32 = vld [vmem:[%s3114_s1 + $0x41] sm:$0x1] }
 0xe1f   :  { %2492 = vmatmul.mubr.msk.f32.vlgmr.msra.gmra.mrb[14].mxu1 %vm163_vm4, %v1430_v31  ;;  %2581 = vmatprep.subr.bf16.mxu1 %v2708_v34  ;;  %v1747_v31 = vld [vmem:[%s3114_s1 + $0x60] sm:$0xff] }
 0xe20   :  { %2510 = vmatprep.mubr.msk.f32.mxu1 %vm2702_vm1, %v2701_v1  ;;  %1773 = vperm.xlu1 %2637, %v1747_v31  }
 0xe21   :  { %2006 = vrot.lane.b32.xlu0 %v2000_v32, %s2709_s12 }
 0xef2   :  { %v1499_v18 = vpop.f32.mrb[14].mxu1 }
 0xef3   :  { %v1503_v33 = vadd.f32 %v1499_v18, %v2945_v28  ;;  %v2493_v5 = vpop.f32.mrb[15].mxu1 }
 0xef5   :  { %v3027_v35 = vadd.f32 %v1506_v8, %v1503_v33  ;;  %v1739_v8 = vpop.permute.xlu0 %1738 }
 0xef7   :  { %v1509_v36 = vsel %vm163_vm4, %v3027_v35, 0.0 }
 0xef8   :  { %v1510_v11 = vrot.slane %v1509_v36, 4 }
 0xefa   :  { %v1511_v37 = vadd.f32 %v1510_v11, %v1509_v36 }
 0xefc   :  { %v1512_v15 = vrot.slane %v1511_v37, 2 }
 0xefe   :  { %v1513_v38 = vadd.f32 %v1512_v15, %v1511_v37  ;;  %v1754_v37 = vpop.permute.xlu1 %1753 }
 0xf00   :  { %v1514_v39 = vrot.slane %v1513_v38, 1 }
 0xf02   :  { %v1515_v40 = vadd.f32 %v1514_v39, %v1513_v38  ;;  %v1759_v15 = vpop.permute.xlu1 %1758  ;;  %v1764_v39 = vpop.permute.xlu0 %1763 }
 0xf04   :  { %v1516_v41 = vmul.f32 0.125, %v1515_v40 }
 0xf06   :  { %v1517_v42 = vsub.f32 %v3027_v35, %v1516_v41 }
 0xf08   :  { %v1518_v43 = vmul.f32 %v1517_v42, %v1517_v42 }
 0xf0a   :  { %v1519_v44 = vsel %vm163_vm4, %v1518_v43, 0.0 }
 0xf0b   :  { %v1520_v45 = vrot.slane %v1519_v44, 4 }
 0xf0d   :  { %v1521_v46 = vadd.f32 %v1520_v45, %v1519_v44 }
 0xf0f   :  { %v1522_v47 = vrot.slane %v1521_v46, 2 }
 0xf11   :  { %v1523_v48 = vadd.f32 %v1522_v47, %v1521_v46 }
 0xf13   :  { %v1524_v49 = vrot.slane %v1523_v48, 1 }
 0xf15   :  { %v1525_v50 = vadd.f32 %v1524_v49, %v1523_v48  ;;  %v1779_v48 = vpop.permute.xlu0 %1778 }
 0xf17   :  { %v1526_v51 = vmul.f32 0.125, %v1525_v50 }
 0xf19   :  { %v1527_v53 = vadd.f32 1e-05, %v1526_v51 }
 0xf1b   :  { %2683 = vrsqrt.f32 %v1527_v53 }
 0xf25   :  { %v2684_v54 = vpop.eup %2683 }
 0xf26   :  { %v1529_v55 = vmul.f32 %v2684_v54, %v1517_v42  ;;  %v1769_v42 = vpop.permute.xlu1 %1768 }
 0xf28   :  { %v1534_v59 = vmul.f32 %v1532_v52, %v1529_v55  ;;  %v1749_v52 = vld [vmem:[%s3114_s1 + $0x70] sm:$0xff] }
 0xf29   :  { %1783 = vperm.xlu1 %2637, %v1749_v52  }
 0xf2a   :  { %v1539_v58 = vadd.f32 %v1537_v56, %v1534_v59  ;;  %v1774_v49 = vpop.permute.xlu1 %1773  ;;  %v1789_v56 = vpop.permute.xlu0 %1788 }
 0xf2c   :  { %2494 = vmatprep.subr.mxu0 %v1539_v58 }
 0xf2d   :  { %2495 = vmatpush3.msra.mxu0 %v1539_v58  ;;  %1926 = vrot.lane.b32.xlu1 %v1920_v25, %s2709_s12 }
 0xf2e   :  { %2497 = vmatmul.mubr.msk.f32.vlgmr.msra.gmra.mrb[26].mxu0 %vm163_vm4, %v1560_v60 }
 0xf2f   :  { %2499 = vmatprep.mubr.msk.f32.mxu0 %vm163_vm4, %v1562_v61 }
 0xf32   :  { %2500 = vmatmul.mubr.msk.f32.gmra.mrb[28].mxu0 %vm163_vm4, %v1564_v62 }
 0xf33   :  { %2515 = vmatprep.mubr.msk.f32.mxu0 %vm163_vm4, %v1743_v9 }
 0xfa8   :  { %v1784_v60 = vpop.permute.xlu1 %1783 }
0x1001   :  { %v2498_v13 = vpop.f32.mrb[26].mxu0 }
0x1002   :  { %v1645_v2 = vadd.f32 %v2498_v13, %v1546_v0  ;;  %v1639_v4 = vpop.f32.mrb[27].mxu0 }
0x1003   :  { %v1640_v10 = vadd.f32 %v1639_v4, %v1542_v63 }
0x1004   :  { %v1659_v7 = vmax.f32 %v1645_v2, 0.0 }
0x1005   :  { %v1658_v14 = vmax.f32 %v1640_v10, 0.0  ;;  %v2501_v16 = vpop.f32.mrb[28].mxu0 }
0x1006   :  { %v1655_v17 = vadd.f32 %v2501_v16, %v1555_v3  ;;  %v1649_v19 = vpop.f32.mrb[29].mxu0 }
0x1007   :  { %v2582_v20 = vpack.c.bf16 %v1659_v7, %v1658_v14  ;;  %v1650_v21 = vadd.f32 %v1649_v19, %v1550_v6  ;;  %v1927_v7 = vpop.permute.xlu1 %1926  ;;  %v2007_v19 = vpop.permute.xlu0 %2006 }
0x1008   :  { %v1661_v23 = vmax.f32 %v1655_v17, 0.0 }
0x1009   :  { %v1660_v24 = vmax.f32 %v1650_v21, 0.0  ;;  %2583 = vmatpush3.bf16.msra.mxu1 %v2582_v20 }
0x100a   :  { %2584 = vmatprep.subr.bf16.mxu1 %v2708_v34 }
0x100b   :  { %v2585_v26 = vpack.c.bf16 %v1661_v23, %v1660_v24 }
0x100d   :  { %2586 = vmatpush3.bf16.msra.mxu1 %v2585_v26 }
0x100e   :  { %2587 = vmatprep.subr.bf16.mxu1 %v2708_v34 }
0x1010   :  { %2511 = vmatmul.mubr.msk.f32.vlgmr.msra.gmra.mrb[16].mxu1 %vm862_vm6, %v1663_v27 }
0x1011   :  { %2535 = vmatprep.mubr.msk.f32.mxu1 %vm2702_vm1, %v2701_v1 }
0x10e3   :  { %v1732_v18 = vpop.f32.mrb[16].mxu1 }
0x10e4   :  { %v1736_v33 = vadd.f32 %v1732_v18, %v3027_v35  ;;  %v2512_v5 = vpop.f32.mrb[17].mxu1  ;;  %v2717_v35 = vmov 48  }
0x10e5   :  { %2640 = vset.pattern.permute.xlu0 %v2717_v35  ;;  %2639 = vset.pattern.permute.xlu1 %v2717_v35 }
0x10e6   :  { %v1741_v36 = vadd.f32 %v1739_v8, %v1736_v33  ;;  %1923 = vperm.xlu0 %2640, %v1920_v25   ;;  %2003 = vperm.xlu1 %2639, %v2000_v32  }
0x10e8   :  { %v1742_v11 = vadd.f32 %v1741_v36, %v2945_v28  ;;  %v3089_v28 = vld [vmem:[%s3114_s1 + $0xd0] sm:$0x3] }
0x10ea   :  { %2513 = vmatprep.subr.mxu0 %v1742_v11 }
0x10eb   :  { %2514 = vmatpush3.msra.mxu0 %v1742_v11 }
0x10ec   :  { %2516 = vmatmul.mubr.msk.f32.vlgmr.msra.gmra.mrb[30].mxu0 %vm163_vm4, %v1744_v57  ;;  %2549 = vmatprep.subr.mxu0 %v2701_v1 }
0x10ed   :  { %2518 = vmatprep.mubr.msk.f32.mxu0 %vm163_vm4, %v1745_v29 }
0x10f0   :  { %2519 = vmatmul.mubr.msk.f32.gmra.mrb[32].mxu0 %vm163_vm4, %v1746_v22 }
0x10f1   :  { %2521 = vmatprep.mubr.msk.f32.mxu0 %vm163_vm4, %v1747_v31 }
0x10f2   :  { %2550 = vmatpush3.xpose.msk.msra.mxu0 %vm163_vm4, %v3089_v28 }
0x10f4   :  { %2522 = vmatmul.mubr.msk.f32.gmra.mrb[34].mxu0 %vm163_vm4, %v1748_v12 }
0x10f5   :  { %2524 = vmatprep.mubr.msk.f32.mxu0 %vm163_vm4, %v1749_v52 }
0x10f8   :  { %2525 = vmatmul.mubr.msk.f32.gmra.mrb[36].mxu0 %vm163_vm4, %v1750_v30 }
0x10f9   :  { %2551 = vmatprep.mubr.msk.f32.mxu0 %vm2702_vm1, %v2701_v1 }
0x1165   :  { %v1924_v20 = vpop.permute.xlu0 %1923 }
0x11bf   :  { %v2517_v38 = vpop.f32.mrb[30].mxu0 }
0x11c0   :  { %v1879_v40 = vadd.f32 %v2517_v38, %v1759_v15  ;;  %v1873_v41 = vpop.f32.mrb[31].mxu0 }
0x11c1   :  { %v1874_v43 = vadd.f32 %v1873_v41, %v1754_v37 }
0x11c2   :  { %2685 = vtanh.f32 %v1879_v40 }
0x11c3   :  { %2687 = vtanh.f32 %v1874_v43  ;;  %v2520_v44 = vpop.f32.mrb[32].mxu0 }
0x11c4   :  { %v1889_v45 = vadd.f32 %v2520_v44, %v1769_v42  ;;  %v1883_v46 = vpop.f32.mrb[33].mxu0 }
0x11c5   :  { %v1884_v47 = vadd.f32 %v1883_v46, %v1764_v39 }
0x11c6   :  { %2689 = vtanh.f32 %v1889_v45 }
0x11c7   :  { %2691 = vtanh.f32 %v1884_v47  ;;  %v2523_v50 = vpop.f32.mrb[34].mxu0 }
0x11c8   :  { %v1899_v51 = vadd.f32 %v2523_v50, %v1779_v48  ;;  %v1893_v53 = vpop.f32.mrb[35].mxu0 }
0x11c9   :  { %v1894_v54 = vadd.f32 %v1893_v53, %v1774_v49 }
0x11ca   :  { %2693 = vtanh.f32 %v1899_v51 }
0x11cb   :  { %2695 = vtanh.f32 %v1894_v54  ;;  %v2526_v55 = vpop.f32.mrb[36].mxu0 }
0x11cc   :  { %v2686_v59 = vpop.eup %2685  ;;  %v1909_v58 = vadd.f32 %v2526_v55, %v1789_v56  ;;  %v1903_v61 = vpop.f32.mrb[37].mxu0 }
0x11cd   :  { %v2688_v62 = vpop.eup %2687  ;;  %v1904_v63 = vadd.f32 %v1903_v61, %v1784_v60 }
0x11ce   :  { %2697 = vtanh.f32 %v1909_v58  ;;  %v2588_v0 = vpack.c.bf16 %v2686_v59, %v2688_v62 }
0x11cf   :  { %2699 = vtanh.f32 %v1904_v63 }
0x11d0   :  { %v2690_v13 = vpop.eup %2689  ;;  %2589 = vmatpush3.bf16.msra.mxu1 %v2588_v0 }
0x11d1   :  { %v2692_v2 = vpop.eup %2691  ;;  %2590 = vmatprep.subr.bf16.mxu1 %v2708_v34 }
0x11d2   :  { %v2591_v4 = vpack.c.bf16 %v2690_v13, %v2692_v2 }
0x11d4   :  { %v2694_v10 = vpop.eup %2693  ;;  %2592 = vmatpush3.bf16.msra.mxu1 %v2591_v4 }
0x11d5   :  { %v2696_v14 = vpop.eup %2695  ;;  %2593 = vmatprep.subr.bf16.mxu1 %v2708_v34 }
0x11d6   :  { %v2594_v16 = vpack.c.bf16 %v2694_v10, %v2696_v14 }
0x11d7   :  { %2536 = vmatmul.mubr.msk.f32.vlgmr.msra.gmra.mrb[18].mxu1 %vm862_vm6, %v1927_v7 }
0x11d8   :  { %v2698_v3 = vpop.eup %2697  ;;  %2595 = vmatpush3.bf16.msra.mxu1 %v2594_v16  ;;  %2546 = vmatprep.mubr.msk.f32.mxu1 %vm2702_vm1, %v2701_v1 }
0x11d9   :  { %v2700_v6 = vpop.eup %2699  ;;  %2596 = vmatprep.subr.bf16.mxu1 %v2708_v34  ;;  %v2004_v34 = vpop.permute.xlu1 %2003 }
0x11da   :  { %v2597_v17 = vpack.c.bf16 %v2698_v3, %v2700_v6 }
0x11dc   :  { %2598 = vmatpush3.bf16.msra.mxu1 %v2597_v17 }
0x11dd   :  { %2554 = vmatprep.subr.mxu1 %v2701_v1 }
0x11df   :  { %2547 = vmatmul.mubr.msk.f32.vlgmr.msra.gmra.mrb[20].mxu1 %vm862_vm6, %v2007_v19 }
0x11e0   :  { %2556 = vmatprep.mubr.msk.f32.mxu1 %vm2702_vm1, %v2701_v1  ;;  %2555 = vmatpush3.msk.msra.mxu1 %vm2160_vm7, %v3089_v28 }
0x12aa   :  { %v1996_v21 = vpop.f32.mrb[18].mxu1 }
0x12ab   :  { %v1997_v23 = vadd.f32 %v1996_v21, %v1924_v20  ;;  %v2537_v24 = vpop.f32.mrb[19].mxu1 }
0x12ad   :  { %2236 = vst.msk [vmem:[%s3116_s2] sm:$0x1] %vm2234_vm8, %v1997_v23 }
0x12b2   :  { %v2076_v26 = vpop.f32.mrb[20].mxu1 }
0x12b3   :  { %v2077_v27 = vadd.f32 %v2076_v26, %v2004_v34  ;;  %v2548_v9 = vpop.f32.mrb[21].mxu1 }
0x12b5   :  { %2552 = vmatmul.mubr.msk.f32.vlgmr.msra.gmra.mrb[38].mxu0 %vm163_vm4, %v2077_v27 }
0x1388   :  { %v2152_v1 = vpop.f32.mrb[38].mxu0 }
0x1389   :  { %v2553_v29 = vpop.f32.mrb[39].mxu0  ;;  %2557 = vmatmul.mubr.msk.f32.vlgmr.msra.gmra.mrb[22].mxu1 %vm2156_vm9, %v2152_v1 }
0x145c   :  { %v2229_v57 = vpop.f32.mrb[22].mxu1 }
0x145d   :  { %v2233_v12 = vmul.f32 4.0, %v2229_v57  ;;  %v2558_v22 = vpop.f32.mrb[23].mxu1 }
0x145f   :  { %2235 = vst.msk [vmem:[#allocation5] sm:$0x1] %vm2234_vm8, %v2233_v12 }
0x1466   :  { %v2237_v30 = vld [vmem:[#allocation5] sm:$0x1] }
0x1467   :  { %2238 = vst.msk [vmem:[%s3116_s2 + $0x1] sm:$0x1] %vm2234_vm8, %v2237_v30 }

</bundles_post_ra>
